<compile_context>
chip_gen: v7x
topology: tpu7x:2x2x1
jax: 0.10.0
libtpu: 0.0.40
codegen_flags: <defaults>
</compile_context>

<pallas_src>
import functools

import jax
import jax.numpy as jnp
import numpy as np
from jax import lax
from jax.experimental import pallas as pl
from jax.experimental.pallas import tpu as pltpu


# ----------------------------- Pallas kernel --------------------------------
def _bayes_rnn_kernel(x_ref, w_ref, u_ref, b_ref, wo_ref, bo_ref,
                      out_ref, xp_ref, *, hidden, seq_len, batch_tile,
                      proj_chunk, mxu_dtype):
    """One batch-tile of the BayesLSTM recurrence + sigmoid(BayesLinear) head.

    x_ref : (L, TB, D)  time-major inputs for this batch tile (bf16 or f32)
    w_ref : (D, 4H)     input->gates weights (gate order f, i, o, c_hat)
    u_ref : (H, 4H)     hidden->gates weights
    b_ref : (1, 4H)     combined gate bias (b_w + b_u), f32
    wo_ref: (1, H)      output-head weight (row vector), f32
    bo_ref: (1,)        output-head bias, SMEM scalar
    out_ref: (TB, L)    sigmoid probabilities
    xp_ref : (C, TB, 4H) VMEM scratch: chunked input projection x@W + b
    """
    H, L, TB, C = hidden, seq_len, batch_tile, proj_chunk

    # Hoist loop-invariant values (JAX does not CSE broadcasts inside loops).
    w = w_ref[...]                                           # (D, 4H)   MXU dtype
    u = u_ref[...]                                           # (H, 4H)   MXU dtype
    b = b_ref[...]                                           # (1, 4H)   f32
    wo = wo_ref[...]                                         # (1, H)    f32 (implicit sublane bcast)
    bo = bo_ref[0]                                           # SMEM scalar
    lane_t = lax.broadcasted_iota(jnp.int32, (TB, L), 1)     # time index per lane

    h = jnp.zeros((TB, H), jnp.float32)
    c = jnp.zeros((TB, H), jnp.float32)
    logits = jnp.zeros((TB, L), jnp.float32)                 # vreg-resident head output

    # TODO(synk): for long L switch the fully-unrolled Python loops below to
    # lax.fori_loop with a modest unroll factor (4-8) to bound vreg live ranges
    # and compile time, and double-buffer xp_ref (2 chunks) so the next chunk's
    # MXU x@W overlaps the current chunk's EUP/VPU cell-math chain.
    for ck in range(L // C):
        # ---- Phase 1 (chunked): time-independent input projection x@W + b ------
        for j in range(C):
            t = ck * C + j
            xp_ref[j] = (jnp.dot(x_ref[t], w,
                                 preferred_element_type=jnp.float32)
                         + b).astype(xp_ref.dtype)

        # ---- Phase 2: recurrence for the chunk (unrolled; only h@U is serial) ---
        for j in range(C):
            t = ck * C + j
            gates = xp_ref[j].astype(jnp.float32) + jnp.dot(
                h.astype(mxu_dtype), u, preferred_element_type=jnp.float32)
            if 4 * H <= 128:
                # Gates fit one vreg: full-width EUP is effectively free, slice after.
                sig = jax.nn.sigmoid(gates)
                g_t = jnp.tanh(gates)[:, 3 * H:4 * H]
            else:
                # EUP is the narrow unit: only evaluate the columns we need
                # (4H transcendental columns per step instead of 8H).
                sig = jax.nn.sigmoid(gates[:, 0:3 * H])
                g_t = jnp.tanh(gates[:, 3 * H:4 * H])
            f_t = sig[:, 0 * H:1 * H]
            i_t = sig[:, 1 * H:2 * H]
            o_t = sig[:, 2 * H:3 * H]
            c = f_t * c + i_t * g_t
            h = o_t * jnp.tanh(c)
            # TODO(synk): inter-step dropout (drop_prob) is an eval-mode no-op here.

            # Output head for this step: mul + lane-reduce kept vreg-resident.
            lg = jnp.sum(h * wo, axis=-1, keepdims=True)     # (TB, 1)
            # TODO(synk): for L >= 64 replace this O(TB*L) per-step lane-select
            # with per-chunk assembly into a VMEM scratch (static column writes).
            logits = jnp.where(lane_t == t, lg, logits)

    # ---- Phase 3: single dense store -------------------------------------------
    out_ref[...] = jax.nn.sigmoid(logits + bo)


def bayes_rnn_forward(x, w_gates, u_gates, b_gates, w_out, b_out, *,
                      batch_tile=None, proj_chunk=None, mxu_dtype=jnp.bfloat16):
    """x: (B, L, D) float32 -> (B, L) probabilities (matches PyTorch forward)."""
    B, L, D = x.shape
    H = u_gates.shape[0]
    mxu_dtype = jnp.dtype(mxu_dtype)
    xp_dtype = mxu_dtype  # bf16 xp halves Phase-1 store bytes & scratch (v5e/v7x)

    # ---- batch-tile selection (MXU fill / megacore / VMEM budget) --------------
    if batch_tile is None:
        # >= 2 batch tiles lets the 'parallel' grid axis shard across v7x's two
        # TensorCores; tiles must keep TB % 8 == 0 (sublane tiling).  At
        # production shapes prefer TB >= 128 (>= 256 on v6e/v7x) and H a multiple
        # of 128 so the serial per-step (TB,H)x(H,4H) matmul fills the MXU.
        batch_tile = B // 2 if (B % 16 == 0) else B
    TB = batch_tile
    assert B % TB == 0, "batch_tile must divide batch"
    assert TB == B or TB % 8 == 0, "batch_tile must be a multiple of 8 (sublane)"
    nb = B // TB

    # ---- projection-chunk selection: bound the xp scratch (v7x: 64 MiB VMEM) ---
    if proj_chunk is None:
        budget = 4 * 1024 * 1024
        proj_chunk = 1
        for cand in range(1, L + 1):
            if L % cand == 0 and cand * TB * 4 * H * xp_dtype.itemsize <= budget:
                proj_chunk = cand
    assert L % proj_chunk == 0, "proj_chunk must divide seq_len"

    # ---- explicit VMEM limit (raise v5e's 16 MiB default, stay under v7x 64) ---
    in_item = mxu_dtype.itemsize
    vmem_est = (2 * L * TB * D * in_item                       # double-buffered x tile
                + proj_chunk * TB * 4 * H * xp_dtype.itemsize  # xp scratch
                + (D + H + 1) * 4 * H * 4                      # weights + bias
                + 2 * TB * L * 4)                              # output
    vmem_limit = int(min(max(2 * vmem_est, 32 * 1024 * 1024), 64 * 1024 * 1024))

    # Layout plumbing: a single transpose to time-major (L, B, D); the kernel's
    # 3-D BlockSpec slices the batch tile (no reshape chain through HBM).
    x_lbd = jnp.transpose(x.astype(jnp.float32), (1, 0, 2)).astype(mxu_dtype)

    b_gates2 = b_gates.reshape(1, 4 * H).astype(jnp.float32)
    wo_row = w_out.reshape(1, H).astype(jnp.float32)
    bo = b_out.reshape(1).astype(jnp.float32)

    return pl.pallas_call(
        functools.partial(_bayes_rnn_kernel, hidden=H, seq_len=L, batch_tile=TB,
                          proj_chunk=proj_chunk, mxu_dtype=mxu_dtype),
        out_shape=jax.ShapeDtypeStruct((B, L), jnp.float32),
        grid=(nb,),
        in_specs=[
            pl.BlockSpec((L, TB, D), lambda i: (0, i, 0)),           # per-tile inputs
            pl.BlockSpec((D, 4 * H), lambda i: (0, 0)),
            pl.BlockSpec((H, 4 * H), lambda i: (0, 0)),
            pl.BlockSpec((1, 4 * H), lambda i: (0, 0)),
            pl.BlockSpec((1, H), lambda i: (0, 0)),
            pl.BlockSpec(memory_space=pltpu.MemorySpace.SMEM),       # scalar head bias
        ],
        out_specs=pl.BlockSpec((TB, L), lambda i: (i, 0)),
        scratch_shapes=[pltpu.VMEM((proj_chunk, TB, 4 * H), xp_dtype)],
        compiler_params=pltpu.CompilerParams(
            dimension_semantics=("parallel",),                       # batch tiles -> 2 TCs on v7x
            vmem_limit_bytes=vmem_limit),
    )(x_lbd, w_gates.astype(mxu_dtype), u_gates.astype(mxu_dtype),
      b_gates2, wo_row, bo)


# ------------------------ deterministic Bayes params ------------------------
def _sample_bayes_linear(key, in_features, out_features, prior_sigma):
    """One stochastic draw of a torchbnn BayesLinear layer's weights."""
    k1, k2, k3, k4 = jax.random.split(key, 4)
    bound = 1.0 / np.sqrt(in_features)
    w_mu = jax.random.uniform(k1, (out_features, in_features),
                              minval=-bound, maxval=bound, dtype=jnp.float32)
    b_mu = jax.random.uniform(k2, (out_features,),
                              minval=-bound, maxval=bound, dtype=jnp.float32)
    w_eps = jax.random.normal(k3, (out_features, in_features), dtype=jnp.float32)
    b_eps = jax.random.normal(k4, (out_features,), dtype=jnp.float32)
    # log_sigma initialized to log(prior_sigma)  =>  sigma == prior_sigma
    w = w_mu + prior_sigma * w_eps
    b = b_mu + prior_sigma * b_eps
    return w, b


def build_params(key, input_size, hidden_dim, prior_sigma=0.1):
    """Pack the 4 W-linears, 4 U-linears and the output head."""
    keys = jax.random.split(key, 9)
    w_cols, u_cols, b_cols = [], [], []
    for g in range(4):                     # gate order: f, i, o, c_hat
        w_g, bw_g = _sample_bayes_linear(keys[g], input_size, hidden_dim, prior_sigma)
        u_g, bu_g = _sample_bayes_linear(keys[4 + g], hidden_dim, hidden_dim, prior_sigma)
        w_cols.append(w_g.T)               # (D, H)
        u_cols.append(u_g.T)               # (H, H)
        b_cols.append(bw_g + bu_g)         # (H,)
    w_gates = jnp.concatenate(w_cols, axis=1)   # (D, 4H)
    u_gates = jnp.concatenate(u_cols, axis=1)   # (H, 4H)
    b_gates = jnp.concatenate(b_cols, axis=0)   # (4H,)
    w_head, b_head = _sample_bayes_linear(keys[8], hidden_dim, 1, prior_sigma)
    return w_gates, u_gates, b_gates, w_head.T, b_head   # head: (H,1), (1,)


# ------------------------------ pure-JAX reference ---------------------------
def reference_forward(x, w_gates, u_gates, b_gates, w_out, b_out):
    B, L, D = x.shape
    H = u_gates.shape[0]
    h = jnp.zeros((B, H), jnp.float32)
    c = jnp.zeros((B, H), jnp.float32)
    hs = []
    for t in range(L):
        gates = x[:, t, :] @ w_gates + h @ u_gates + b_gates[None, :]
        f = jax.nn.sigmoid(gates[:, 0 * H:1 * H])
        i = jax.nn.sigmoid(gates[:, 1 * H:2 * H])
        o = jax.nn.sigmoid(gates[:, 2 * H:3 * H])
        g = jnp.tanh(gates[:, 3 * H:4 * H])
        c = f * c + i * g
        h = o * jnp.tanh(c)
        hs.append(h)
    lstm_out = jnp.stack(hs, axis=1).reshape(B * L, H)     # batch-first flatten
    out = jax.nn.sigmoid(lstm_out @ w_out + b_out[None, :])
    return out.reshape(B, L)


# ----------------------------------- main ------------------------------------
if __name__ == "__main__":
    B, L, D, H = 2, 8, 4, 32

    key = jax.random.PRNGKey(0)
    k_x, k_p = jax.random.split(key)
    x = jax.random.normal(k_x, (B, L, D), dtype=jnp.float32)

    params = build_params(k_p, input_size=D, hidden_dim=H, prior_sigma=0.1)
    ref = reference_forward(x, *params)

    # Exact-parity mode: f32 MXU operands, tight tolerance against the reference.
    out_f32 = jax.block_until_ready(
        bayes_rnn_forward(x, *params, mxu_dtype=jnp.float32))
    np.testing.assert_allclose(np.asarray(out_f32), np.asarray(ref),
                               rtol=1e-5, atol=1e-5)

    # Production mode: bf16 MXU operands (default); looser tolerance vs. the f32
    # reference because gate pre-activations are rounded to bf16.
    out_bf16 = jax.block_until_ready(bayes_rnn_forward(x, *params))
    np.testing.assert_allclose(np.asarray(out_bf16), np.asarray(ref),
                               rtol=5e-2, atol=5e-2)

    assert out_f32.shape == (B, L) and out_bf16.shape == (B, L)
    print("KERNEL_OK")
</pallas_src>

<mosaic_0001>
module attributes {stable_mosaic.version = 11 : i64} {
  func.func @_bayes_rnn_kernel(%arg0: i32, %arg1: memref<8x2x4xf32, #tpu.memory_space<vmem>>, %arg2: memref<4x128xf32, #tpu.memory_space<vmem>>, %arg3: memref<32x128xf32, #tpu.memory_space<vmem>>, %arg4: memref<1x128xf32, #tpu.memory_space<vmem>>, %arg5: memref<1x32xf32, #tpu.memory_space<vmem>>, %arg6: memref<1xf32, #tpu.memory_space<smem>>, %arg7: memref<2x8xf32, #tpu.memory_space<vmem>>, %arg8: memref<8x2x128xf32, #tpu.memory_space<vmem>>) attributes {dimension_semantics = [#tpu.dimension_semantics<parallel>], iteration_bounds = array<i64: 1>, scalar_prefetch = 0 : i64, scratch_operands = 1 : i64, tpu.core_type = #tpu.core_type<tc>, window_params = [{transform_indices = @transform_0, window_bounds = array<i64: 8, 2, 4>}, {pipeline_mode = #tpu.pipeline_mode<synchronous>, transform_indices = @transform_1, window_bounds = array<i64: 4, 128>}, {pipeline_mode = #tpu.pipeline_mode<synchronous>, transform_indices = @transform_2, window_bounds = array<i64: 32, 128>}, {pipeline_mode = #tpu.pipeline_mode<synchronous>, transform_indices = @transform_3, window_bounds = array<i64: 1, 128>}, {pipeline_mode = #tpu.pipeline_mode<synchronous>, transform_indices = @transform_4, window_bounds = array<i64: 1, 32>}, {transform_indices = @transform_5, window_bounds = array<i64: 1>}, {transform_indices = @transform_6, window_bounds = array<i64: 2, 8>}]} {
    %c0 = arith.constant 0 : index
    %c0_0 = arith.constant 0 : index
    %0 = vector.load %arg2[%c0, %c0_0] : memref<4x128xf32, #tpu.memory_space<vmem>>, vector<4x128xf32>
    %c0_1 = arith.constant 0 : index
    %c0_2 = arith.constant 0 : index
    %1 = vector.load %arg3[%c0_1, %c0_2] : memref<32x128xf32, #tpu.memory_space<vmem>>, vector<32x128xf32>
    %c0_3 = arith.constant 0 : index
    %c0_4 = arith.constant 0 : index
    %2 = vector.load %arg4[%c0_3, %c0_4] : memref<1x128xf32, #tpu.memory_space<vmem>>, vector<1x128xf32>
    %c0_5 = arith.constant 0 : index
    %c0_6 = arith.constant 0 : index
    %3 = vector.load %arg5[%c0_5, %c0_6] : memref<1x32xf32, #tpu.memory_space<vmem>>, vector<1x32xf32>
    %c0_7 = arith.constant 0 : index
    %4 = memref.load %arg6[%c0_7] : memref<1xf32, #tpu.memory_space<smem>>
    %5 = tpu.iota {dimensions = array<i32: 1>} : vector<2x8xi32>
    %cst = arith.constant 0.000000e+00 : f32
    %6 = vector.broadcast %cst : f32 to vector<2x32xf32>
    %cst_8 = arith.constant 0.000000e+00 : f32
    %7 = vector.broadcast %cst_8 : f32 to vector<2x32xf32>
    %cst_9 = arith.constant 0.000000e+00 : f32
    %8 = vector.broadcast %cst_9 : f32 to vector<2x8xf32>
    %c0_10 = arith.constant 0 : index
    %c0_11 = arith.constant 0 : index
    %c0_12 = arith.constant 0 : index
    %9 = vector.load %arg1[%c0_10, %c0_11, %c0_12] : memref<8x2x4xf32, #tpu.memory_space<vmem>>, vector<1x2x4xf32>
    %10 = vector.shape_cast %9 : vector<1x2x4xf32> to vector<2x4xf32>
    %cst_13 = arith.constant dense<0.000000e+00> : vector<2x128xf32>
    %11 = tpu.matmul %10, %0, %cst_13 {dimension_numbers = #tpu.dot_dimension_numbers<[1], [0], [0], [1], [0, 0, 1, 1], [], []>} : vector<2x4xf32>, vector<4x128xf32>, vector<2x128xf32> -> vector<2x128xf32>
    %12 = vector.broadcast %2 : vector<1x128xf32> to vector<2x128xf32>
    %13 = arith.addf %11, %12 : vector<2x128xf32>
    %c0_14 = arith.constant 0 : index
    %c0_15 = arith.constant 0 : index
    %c0_16 = arith.constant 0 : index
    %14 = vector.load %arg8[%c0_14, %c0_15, %c0_16] : memref<8x2x128xf32, #tpu.memory_space<vmem>>, vector<1x2x128xf32>
    %15 = vector.shape_cast %14 : vector<1x2x128xf32> to vector<2x128xf32>
    %16 = vector.shape_cast %13 : vector<2x128xf32> to vector<1x2x128xf32>
    tpu.vector_store %arg8[%c0_14, %c0_15, %c0_16], %16 {strides = array<i32>} : memref<8x2x128xf32, #tpu.memory_space<vmem>>, vector<1x2x128xf32>,
    %c1 = arith.constant 1 : index
    %c0_17 = arith.constant 0 : index
    %c0_18 = arith.constant 0 : index
    %17 = vector.load %arg1[%c1, %c0_17, %c0_18] : memref<8x2x4xf32, #tpu.memory_space<vmem>>, vector<1x2x4xf32>
    %18 = vector.shape_cast %17 : vector<1x2x4xf32> to vector<2x4xf32>
    %cst_19 = arith.constant dense<0.000000e+00> : vector<2x128xf32>
    %19 = tpu.matmul %18, %0, %cst_19 {dimension_numbers = #tpu.dot_dimension_numbers<[1], [0], [0], [1], [0, 0, 1, 1], [], []>} : vector<2x4xf32>, vector<4x128xf32>, vector<2x128xf32> -> vector<2x128xf32>
    %20 = vector.broadcast %2 : vector<1x128xf32> to vector<2x128xf32>
    %21 = arith.addf %19, %20 : vector<2x128xf32>
    %c1_20 = arith.constant 1 : index
    %c0_21 = arith.constant 0 : index
    %c0_22 = arith.constant 0 : index
    %22 = vector.load %arg8[%c1_20, %c0_21, %c0_22] : memref<8x2x128xf32, #tpu.memory_space<vmem>>, vector<1x2x128xf32>
    %23 = vector.shape_cast %22 : vector<1x2x128xf32> to vector<2x128xf32>
    %24 = vector.shape_cast %21 : vector<2x128xf32> to vector<1x2x128xf32>
    tpu.vector_store %arg8[%c1_20, %c0_21, %c0_22], %24 {strides = array<i32>} : memref<8x2x128xf32, #tpu.memory_space<vmem>>, vector<1x2x128xf32>,
    %c2 = arith.constant 2 : index
    %c0_23 = arith.constant 0 : index
    %c0_24 = arith.constant 0 : index
    %25 = vector.load %arg1[%c2, %c0_23, %c0_24] : memref<8x2x4xf32, #tpu.memory_space<vmem>>, vector<1x2x4xf32>
    %26 = vector.shape_cast %25 : vector<1x2x4xf32> to vector<2x4xf32>
    %cst_25 = arith.constant dense<0.000000e+00> : vector<2x128xf32>
    %27 = tpu.matmul %26, %0, %cst_25 {dimension_numbers = #tpu.dot_dimension_numbers<[1], [0], [0], [1], [0, 0, 1, 1], [], []>} : vector<2x4xf32>, vector<4x128xf32>, vector<2x128xf32> -> vector<2x128xf32>
    %28 = vector.broadcast %2 : vector<1x128xf32> to vector<2x128xf32>
    %29 = arith.addf %27, %28 : vector<2x128xf32>
    %c2_26 = arith.constant 2 : index
    %c0_27 = arith.constant 0 : index
    %c0_28 = arith.constant 0 : index
    %30 = vector.load %arg8[%c2_26, %c0_27, %c0_28] : memref<8x2x128xf32, #tpu.memory_space<vmem>>, vector<1x2x128xf32>
    %31 = vector.shape_cast %30 : vector<1x2x128xf32> to vector<2x128xf32>
    %32 = vector.shape_cast %29 : vector<2x128xf32> to vector<1x2x128xf32>
    tpu.vector_store %arg8[%c2_26, %c0_27, %c0_28], %32 {strides = array<i32>} : memref<8x2x128xf32, #tpu.memory_space<vmem>>, vector<1x2x128xf32>,
    %c3 = arith.constant 3 : index
    %c0_29 = arith.constant 0 : index
    %c0_30 = arith.constant 0 : index
    %33 = vector.load %arg1[%c3, %c0_29, %c0_30] : memref<8x2x4xf32, #tpu.memory_space<vmem>>, vector<1x2x4xf32>
    %34 = vector.shape_cast %33 : vector<1x2x4xf32> to vector<2x4xf32>
    %cst_31 = arith.constant dense<0.000000e+00> : vector<2x128xf32>
    %35 = tpu.matmul %34, %0, %cst_31 {dimension_numbers = #tpu.dot_dimension_numbers<[1], [0], [0], [1], [0, 0, 1, 1], [], []>} : vector<2x4xf32>, vector<4x128xf32>, vector<2x128xf32> -> vector<2x128xf32>
    %36 = vector.broadcast %2 : vector<1x128xf32> to vector<2x128xf32>
    %37 = arith.addf %35, %36 : vector<2x128xf32>
    %c3_32 = arith.constant 3 : index
    %c0_33 = arith.constant 0 : index
    %c0_34 = arith.constant 0 : index
    %38 = vector.load %arg8[%c3_32, %c0_33, %c0_34] : memref<8x2x128xf32, #tpu.memory_space<vmem>>, vector<1x2x128xf32>
    %39 = vector.shape_cast %38 : vector<1x2x128xf32> to vector<2x128xf32>
    %40 = vector.shape_cast %37 : vector<2x128xf32> to vector<1x2x128xf32>
    tpu.vector_store %arg8[%c3_32, %c0_33, %c0_34], %40 {strides = array<i32>} : memref<8x2x128xf32, #tpu.memory_space<vmem>>, vector<1x2x128xf32>,
    %c4 = arith.constant 4 : index
    %c0_35 = arith.constant 0 : index
    %c0_36 = arith.constant 0 : index
    %41 = vector.load %arg1[%c4, %c0_35, %c0_36] : memref<8x2x4xf32, #tpu.memory_space<vmem>>, vector<1x2x4xf32>
    %42 = vector.shape_cast %41 : vector<1x2x4xf32> to vector<2x4xf32>
    %cst_37 = arith.constant dense<0.000000e+00> : vector<2x128xf32>
    %43 = tpu.matmul %42, %0, %cst_37 {dimension_numbers = #tpu.dot_dimension_numbers<[1], [0], [0], [1], [0, 0, 1, 1], [], []>} : vector<2x4xf32>, vector<4x128xf32>, vector<2x128xf32> -> vector<2x128xf32>
    %44 = vector.broadcast %2 : vector<1x128xf32> to vector<2x128xf32>
    %45 = arith.addf %43, %44 : vector<2x128xf32>
    %c4_38 = arith.constant 4 : index
    %c0_39 = arith.constant 0 : index
    %c0_40 = arith.constant 0 : index
    %46 = vector.load %arg8[%c4_38, %c0_39, %c0_40] : memref<8x2x128xf32, #tpu.memory_space<vmem>>, vector<1x2x128xf32>
    %47 = vector.shape_cast %46 : vector<1x2x128xf32> to vector<2x128xf32>
    %48 = vector.shape_cast %45 : vector<2x128xf32> to vector<1x2x128xf32>
    tpu.vector_store %arg8[%c4_38, %c0_39, %c0_40], %48 {strides = array<i32>} : memref<8x2x128xf32, #tpu.memory_space<vmem>>, vector<1x2x128xf32>,
    %c5 = arith.constant 5 : index
    %c0_41 = arith.constant 0 : index
    %c0_42 = arith.constant 0 : index
    %49 = vector.load %arg1[%c5, %c0_41, %c0_42] : memref<8x2x4xf32, #tpu.memory_space<vmem>>, vector<1x2x4xf32>
    %50 = vector.shape_cast %49 : vector<1x2x4xf32> to vector<2x4xf32>
    %cst_43 = arith.constant dense<0.000000e+00> : vector<2x128xf32>
    %51 = tpu.matmul %50, %0, %cst_43 {dimension_numbers = #tpu.dot_dimension_numbers<[1], [0], [0], [1], [0, 0, 1, 1], [], []>} : vector<2x4xf32>, vector<4x128xf32>, vector<2x128xf32> -> vector<2x128xf32>
    %52 = vector.broadcast %2 : vector<1x128xf32> to vector<2x128xf32>
    %53 = arith.addf %51, %52 : vector<2x128xf32>
    %c5_44 = arith.constant 5 : index
    %c0_45 = arith.constant 0 : index
    %c0_46 = arith.constant 0 : index
    %54 = vector.load %arg8[%c5_44, %c0_45, %c0_46] : memref<8x2x128xf32, #tpu.memory_space<vmem>>, vector<1x2x128xf32>
    %55 = vector.shape_cast %54 : vector<1x2x128xf32> to vector<2x128xf32>
    %56 = vector.shape_cast %53 : vector<2x128xf32> to vector<1x2x128xf32>
    tpu.vector_store %arg8[%c5_44, %c0_45, %c0_46], %56 {strides = array<i32>} : memref<8x2x128xf32, #tpu.memory_space<vmem>>, vector<1x2x128xf32>,
    %c6 = arith.constant 6 : index
    %c0_47 = arith.constant 0 : index
    %c0_48 = arith.constant 0 : index
    %57 = vector.load %arg1[%c6, %c0_47, %c0_48] : memref<8x2x4xf32, #tpu.memory_space<vmem>>, vector<1x2x4xf32>
    %58 = vector.shape_cast %57 : vector<1x2x4xf32> to vector<2x4xf32>
    %cst_49 = arith.constant dense<0.000000e+00> : vector<2x128xf32>
    %59 = tpu.matmul %58, %0, %cst_49 {dimension_numbers = #tpu.dot_dimension_numbers<[1], [0], [0], [1], [0, 0, 1, 1], [], []>} : vector<2x4xf32>, vector<4x128xf32>, vector<2x128xf32> -> vector<2x128xf32>
    %60 = vector.broadcast %2 : vector<1x128xf32> to vector<2x128xf32>
    %61 = arith.addf %59, %60 : vector<2x128xf32>
    %c6_50 = arith.constant 6 : index
    %c0_51 = arith.constant 0 : index
    %c0_52 = arith.constant 0 : index
    %62 = vector.load %arg8[%c6_50, %c0_51, %c0_52] : memref<8x2x128xf32, #tpu.memory_space<vmem>>, vector<1x2x128xf32>
    %63 = vector.shape_cast %62 : vector<1x2x128xf32> to vector<2x128xf32>
    %64 = vector.shape_cast %61 : vector<2x128xf32> to vector<1x2x128xf32>
    tpu.vector_store %arg8[%c6_50, %c0_51, %c0_52], %64 {strides = array<i32>} : memref<8x2x128xf32, #tpu.memory_space<vmem>>, vector<1x2x128xf32>,
    %c7 = arith.constant 7 : index
    %c0_53 = arith.constant 0 : index
    %c0_54 = arith.constant 0 : index
    %65 = vector.load %arg1[%c7, %c0_53, %c0_54] : memref<8x2x4xf32, #tpu.memory_space<vmem>>, vector<1x2x4xf32>
    %66 = vector.shape_cast %65 : vector<1x2x4xf32> to vector<2x4xf32>
    %cst_55 = arith.constant dense<0.000000e+00> : vector<2x128xf32>
    %67 = tpu.matmul %66, %0, %cst_55 {dimension_numbers = #tpu.dot_dimension_numbers<[1], [0], [0], [1], [0, 0, 1, 1], [], []>} : vector<2x4xf32>, vector<4x128xf32>, vector<2x128xf32> -> vector<2x128xf32>
    %68 = vector.broadcast %2 : vector<1x128xf32> to vector<2x128xf32>
    %69 = arith.addf %67, %68 : vector<2x128xf32>
    %c7_56 = arith.constant 7 : index
    %c0_57 = arith.constant 0 : index
    %c0_58 = arith.constant 0 : index
    %70 = vector.load %arg8[%c7_56, %c0_57, %c0_58] : memref<8x2x128xf32, #tpu.memory_space<vmem>>, vector<1x2x128xf32>
    %71 = vector.shape_cast %70 : vector<1x2x128xf32> to vector<2x128xf32>
    %72 = vector.shape_cast %69 : vector<2x128xf32> to vector<1x2x128xf32>
    tpu.vector_store %arg8[%c7_56, %c0_57, %c0_58], %72 {strides = array<i32>} : memref<8x2x128xf32, #tpu.memory_space<vmem>>, vector<1x2x128xf32>,
    %c0_59 = arith.constant 0 : index
    %c0_60 = arith.constant 0 : index
    %c0_61 = arith.constant 0 : index
    %73 = vector.load %arg8[%c0_59, %c0_60, %c0_61] : memref<8x2x128xf32, #tpu.memory_space<vmem>>, vector<1x2x128xf32>
    %74 = vector.shape_cast %73 : vector<1x2x128xf32> to vector<2x128xf32>
    %cst_62 = arith.constant dense<0.000000e+00> : vector<2x128xf32>
    %75 = tpu.matmul %6, %1, %cst_62 {dimension_numbers = #tpu.dot_dimension_numbers<[1], [0], [0], [1], [0, 0, 1, 1], [], []>} : vector<2x32xf32>, vector<32x128xf32>, vector<2x128xf32> -> vector<2x128xf32>
    %76 = arith.addf %74, %75 : vector<2x128xf32>
    %77 = arith.negf %76 : vector<2x128xf32>
    %78 = math.exp %77 : vector<2x128xf32>
    %cst_63 = arith.constant 1.000000e+00 : f32
    %79 = vector.broadcast %cst_63 : f32 to vector<2x128xf32>
    %80 = arith.addf %79, %78 : vector<2x128xf32>
    %81 = arith.divf %79, %80 : vector<2x128xf32>
    %82 = math.tanh %76 : vector<2x128xf32>
    %83 = vector.extract_strided_slice %82 {offsets = [0, 96], sizes = [2, 32], strides = [1, 1]} : vector<2x128xf32> to vector<2x32xf32>
    %84 = vector.extract_strided_slice %81 {offsets = [0, 0], sizes = [2, 32], strides = [1, 1]} : vector<2x128xf32> to vector<2x32xf32>
    %85 = vector.extract_strided_slice %81 {offsets = [0, 32], sizes = [2, 32], strides = [1, 1]} : vector<2x128xf32> to vector<2x32xf32>
    %86 = vector.extract_strided_slice %81 {offsets = [0, 64], sizes = [2, 32], strides = [1, 1]} : vector<2x128xf32> to vector<2x32xf32>
    %87 = arith.mulf %84, %7 : vector<2x32xf32>
    %88 = arith.mulf %85, %83 : vector<2x32xf32>
    %89 = arith.addf %87, %88 : vector<2x32xf32>
    %90 = math.tanh %89 : vector<2x32xf32>
    %91 = arith.mulf %86, %90 : vector<2x32xf32>
    %92 = vector.broadcast %3 : vector<1x32xf32> to vector<2x32xf32>
    %93 = arith.mulf %91, %92 : vector<2x32xf32>
    %cst_64 = arith.constant dense<0.000000e+00> : vector<2xf32>
    %94 = vector.multi_reduction <add>, %93, %cst_64 [1] : vector<2x32xf32> to vector<2xf32>
    %95 = vector.shape_cast %94 : vector<2xf32> to vector<2x1xf32>
    %c0_i32 = arith.constant 0 : i32
    %96 = vector.broadcast %c0_i32 : i32 to vector<2x8xi32>
    %97 = arith.cmpi eq, %5, %96 : vector<2x8xi32>
    %98 = vector.shape_cast %95 : vector<2x1xf32> to vector<2x1xf32>
    %99 = vector.broadcast %98 : vector<2x1xf32> to vector<2x8xf32>
    %100 = arith.select %97, %99, %8 : vector<2x8xi1>, vector<2x8xf32>
    %c1_65 = arith.constant 1 : index
    %c0_66 = arith.constant 0 : index
    %c0_67 = arith.constant 0 : index
    %101 = vector.load %arg8[%c1_65, %c0_66, %c0_67] : memref<8x2x128xf32, #tpu.memory_space<vmem>>, vector<1x2x128xf32>
    %102 = vector.shape_cast %101 : vector<1x2x128xf32> to vector<2x128xf32>
    %cst_68 = arith.constant dense<0.000000e+00> : vector<2x128xf32>
    %103 = tpu.matmul %91, %1, %cst_68 {dimension_numbers = #tpu.dot_dimension_numbers<[1], [0], [0], [1], [0, 0, 1, 1], [], []>} : vector<2x32xf32>, vector<32x128xf32>, vector<2x128xf32> -> vector<2x128xf32>
    %104 = arith.addf %102, %103 : vector<2x128xf32>
    %105 = arith.negf %104 : vector<2x128xf32>
    %106 = math.exp %105 : vector<2x128xf32>
    %cst_69 = arith.constant 1.000000e+00 : f32
    %107 = vector.broadcast %cst_69 : f32 to vector<2x128xf32>
    %108 = arith.addf %107, %106 : vector<2x128xf32>
    %109 = arith.divf %107, %108 : vector<2x128xf32>
    %110 = math.tanh %104 : vector<2x128xf32>
    %111 = vector.extract_strided_slice %110 {offsets = [0, 96], sizes = [2, 32], strides = [1, 1]} : vector<2x128xf32> to vector<2x32xf32>
    %112 = vector.extract_strided_slice %109 {offsets = [0, 0], sizes = [2, 32], strides = [1, 1]} : vector<2x128xf32> to vector<2x32xf32>
    %113 = vector.extract_strided_slice %109 {offsets = [0, 32], sizes = [2, 32], strides = [1, 1]} : vector<2x128xf32> to vector<2x32xf32>
    %114 = vector.extract_strided_slice %109 {offsets = [0, 64], sizes = [2, 32], strides = [1, 1]} : vector<2x128xf32> to vector<2x32xf32>
    %115 = arith.mulf %112, %89 : vector<2x32xf32>
    %116 = arith.mulf %113, %111 : vector<2x32xf32>
    %117 = arith.addf %115, %116 : vector<2x32xf32>
    %118 = math.tanh %117 : vector<2x32xf32>
    %119 = arith.mulf %114, %118 : vector<2x32xf32>
    %120 = vector.broadcast %3 : vector<1x32xf32> to vector<2x32xf32>
    %121 = arith.mulf %119, %120 : vector<2x32xf32>
    %cst_70 = arith.constant dense<0.000000e+00> : vector<2xf32>
    %122 = vector.multi_reduction <add>, %121, %cst_70 [1] : vector<2x32xf32> to vector<2xf32>
    %123 = vector.shape_cast %122 : vector<2xf32> to vector<2x1xf32>
    %c1_i32 = arith.constant 1 : i32
    %124 = vector.broadcast %c1_i32 : i32 to vector<2x8xi32>
    %125 = arith.cmpi eq, %5, %124 : vector<2x8xi32>
    %126 = vector.shape_cast %123 : vector<2x1xf32> to vector<2x1xf32>
    %127 = vector.broadcast %126 : vector<2x1xf32> to vector<2x8xf32>
    %128 = arith.select %125, %127, %100 : vector<2x8xi1>, vector<2x8xf32>
    %c2_71 = arith.constant 2 : index
    %c0_72 = arith.constant 0 : index
    %c0_73 = arith.constant 0 : index
    %129 = vector.load %arg8[%c2_71, %c0_72, %c0_73] : memref<8x2x128xf32, #tpu.memory_space<vmem>>, vector<1x2x128xf32>
    %130 = vector.shape_cast %129 : vector<1x2x128xf32> to vector<2x128xf32>
    %cst_74 = arith.constant dense<0.000000e+00> : vector<2x128xf32>
    %131 = tpu.matmul %119, %1, %cst_74 {dimension_numbers = #tpu.dot_dimension_numbers<[1], [0], [0], [1], [0, 0, 1, 1], [], []>} : vector<2x32xf32>, vector<32x128xf32>, vector<2x128xf32> -> vector<2x128xf32>
    %132 = arith.addf %130, %131 : vector<2x128xf32>
    %133 = arith.negf %132 : vector<2x128xf32>
    %134 = math.exp %133 : vector<2x128xf32>
    %cst_75 = arith.constant 1.000000e+00 : f32
    %135 = vector.broadcast %cst_75 : f32 to vector<2x128xf32>
    %136 = arith.addf %135, %134 : vector<2x128xf32>
    %137 = arith.divf %135, %136 : vector<2x128xf32>
    %138 = math.tanh %132 : vector<2x128xf32>
    %139 = vector.extract_strided_slice %138 {offsets = [0, 96], sizes = [2, 32], strides = [1, 1]} : vector<2x128xf32> to vector<2x32xf32>
    %140 = vector.extract_strided_slice %137 {offsets = [0, 0], sizes = [2, 32], strides = [1, 1]} : vector<2x128xf32> to vector<2x32xf32>
    %141 = vector.extract_strided_slice %137 {offsets = [0, 32], sizes = [2, 32], strides = [1, 1]} : vector<2x128xf32> to vector<2x32xf32>
    %142 = vector.extract_strided_slice %137 {offsets = [0, 64], sizes = [2, 32], strides = [1, 1]} : vector<2x128xf32> to vector<2x32xf32>
    %143 = arith.mulf %140, %117 : vector<2x32xf32>
    %144 = arith.mulf %141, %139 : vector<2x32xf32>
    %145 = arith.addf %143, %144 : vector<2x32xf32>
    %146 = math.tanh %145 : vector<2x32xf32>
    %147 = arith.mulf %142, %146 : vector<2x32xf32>
    %148 = vector.broadcast %3 : vector<1x32xf32> to vector<2x32xf32>
    %149 = arith.mulf %147, %148 : vector<2x32xf32>
    %cst_76 = arith.constant dense<0.000000e+00> : vector<2xf32>
    %150 = vector.multi_reduction <add>, %149, %cst_76 [1] : vector<2x32xf32> to vector<2xf32>
    %151 = vector.shape_cast %150 : vector<2xf32> to vector<2x1xf32>
    %c2_i32 = arith.constant 2 : i32
    %152 = vector.broadcast %c2_i32 : i32 to vector<2x8xi32>
    %153 = arith.cmpi eq, %5, %152 : vector<2x8xi32>
    %154 = vector.shape_cast %151 : vector<2x1xf32> to vector<2x1xf32>
    %155 = vector.broadcast %154 : vector<2x1xf32> to vector<2x8xf32>
    %156 = arith.select %153, %155, %128 : vector<2x8xi1>, vector<2x8xf32>
    %c3_77 = arith.constant 3 : index
    %c0_78 = arith.constant 0 : index
    %c0_79 = arith.constant 0 : index
    %157 = vector.load %arg8[%c3_77, %c0_78, %c0_79] : memref<8x2x128xf32, #tpu.memory_space<vmem>>, vector<1x2x128xf32>
    %158 = vector.shape_cast %157 : vector<1x2x128xf32> to vector<2x128xf32>
    %cst_80 = arith.constant dense<0.000000e+00> : vector<2x128xf32>
    %159 = tpu.matmul %147, %1, %cst_80 {dimension_numbers = #tpu.dot_dimension_numbers<[1], [0], [0], [1], [0, 0, 1, 1], [], []>} : vector<2x32xf32>, vector<32x128xf32>, vector<2x128xf32> -> vector<2x128xf32>
    %160 = arith.addf %158, %159 : vector<2x128xf32>
    %161 = arith.negf %160 : vector<2x128xf32>
    %162 = math.exp %161 : vector<2x128xf32>
    %cst_81 = arith.constant 1.000000e+00 : f32
    %163 = vector.broadcast %cst_81 : f32 to vector<2x128xf32>
    %164 = arith.addf %163, %162 : vector<2x128xf32>
    %165 = arith.divf %163, %164 : vector<2x128xf32>
    %166 = math.tanh %160 : vector<2x128xf32>
    %167 = vector.extract_strided_slice %166 {offsets = [0, 96], sizes = [2, 32], strides = [1, 1]} : vector<2x128xf32> to vector<2x32xf32>
    %168 = vector.extract_strided_slice %165 {offsets = [0, 0], sizes = [2, 32], strides = [1, 1]} : vector<2x128xf32> to vector<2x32xf32>
    %169 = vector.extract_strided_slice %165 {offsets = [0, 32], sizes = [2, 32], strides = [1, 1]} : vector<2x128xf32> to vector<2x32xf32>
    %170 = vector.extract_strided_slice %165 {offsets = [0, 64], sizes = [2, 32], strides = [1, 1]} : vector<2x128xf32> to vector<2x32xf32>
    %171 = arith.mulf %168, %145 : vector<2x32xf32>
    %172 = arith.mulf %169, %167 : vector<2x32xf32>
    %173 = arith.addf %171, %172 : vector<2x32xf32>
    %174 = math.tanh %173 : vector<2x32xf32>
    %175 = arith.mulf %170, %174 : vector<2x32xf32>
    %176 = vector.broadcast %3 : vector<1x32xf32> to vector<2x32xf32>
    %177 = arith.mulf %175, %176 : vector<2x32xf32>
    %cst_82 = arith.constant dense<0.000000e+00> : vector<2xf32>
    %178 = vector.multi_reduction <add>, %177, %cst_82 [1] : vector<2x32xf32> to vector<2xf32>
    %179 = vector.shape_cast %178 : vector<2xf32> to vector<2x1xf32>
    %c3_i32 = arith.constant 3 : i32
    %180 = vector.broadcast %c3_i32 : i32 to vector<2x8xi32>
    %181 = arith.cmpi eq, %5, %180 : vector<2x8xi32>
    %182 = vector.shape_cast %179 : vector<2x1xf32> to vector<2x1xf32>
    %183 = vector.broadcast %182 : vector<2x1xf32> to vector<2x8xf32>
    %184 = arith.select %181, %183, %156 : vector<2x8xi1>, vector<2x8xf32>
    %c4_83 = arith.constant 4 : index
    %c0_84 = arith.constant 0 : index
    %c0_85 = arith.constant 0 : index
    %185 = vector.load %arg8[%c4_83, %c0_84, %c0_85] : memref<8x2x128xf32, #tpu.memory_space<vmem>>, vector<1x2x128xf32>
    %186 = vector.shape_cast %185 : vector<1x2x128xf32> to vector<2x128xf32>
    %cst_86 = arith.constant dense<0.000000e+00> : vector<2x128xf32>
    %187 = tpu.matmul %175, %1, %cst_86 {dimension_numbers = #tpu.dot_dimension_numbers<[1], [0], [0], [1], [0, 0, 1, 1], [], []>} : vector<2x32xf32>, vector<32x128xf32>, vector<2x128xf32> -> vector<2x128xf32>
    %188 = arith.addf %186, %187 : vector<2x128xf32>
    %189 = arith.negf %188 : vector<2x128xf32>
    %190 = math.exp %189 : vector<2x128xf32>
    %cst_87 = arith.constant 1.000000e+00 : f32
    %191 = vector.broadcast %cst_87 : f32 to vector<2x128xf32>
    %192 = arith.addf %191, %190 : vector<2x128xf32>
    %193 = arith.divf %191, %192 : vector<2x128xf32>
    %194 = math.tanh %188 : vector<2x128xf32>
    %195 = vector.extract_strided_slice %194 {offsets = [0, 96], sizes = [2, 32], strides = [1, 1]} : vector<2x128xf32> to vector<2x32xf32>
    %196 = vector.extract_strided_slice %193 {offsets = [0, 0], sizes = [2, 32], strides = [1, 1]} : vector<2x128xf32> to vector<2x32xf32>
    %197 = vector.extract_strided_slice %193 {offsets = [0, 32], sizes = [2, 32], strides = [1, 1]} : vector<2x128xf32> to vector<2x32xf32>
    %198 = vector.extract_strided_slice %193 {offsets = [0, 64], sizes = [2, 32], strides = [1, 1]} : vector<2x128xf32> to vector<2x32xf32>
    %199 = arith.mulf %196, %173 : vector<2x32xf32>
    %200 = arith.mulf %197, %195 : vector<2x32xf32>
    %201 = arith.addf %199, %200 : vector<2x32xf32>
    %202 = math.tanh %201 : vector<2x32xf32>
    %203 = arith.mulf %198, %202 : vector<2x32xf32>
    %204 = vector.broadcast %3 : vector<1x32xf32> to vector<2x32xf32>
    %205 = arith.mulf %203, %204 : vector<2x32xf32>
    %cst_88 = arith.constant dense<0.000000e+00> : vector<2xf32>
    %206 = vector.multi_reduction <add>, %205, %cst_88 [1] : vector<2x32xf32> to vector<2xf32>
    %207 = vector.shape_cast %206 : vector<2xf32> to vector<2x1xf32>
    %c4_i32 = arith.constant 4 : i32
    %208 = vector.broadcast %c4_i32 : i32 to vector<2x8xi32>
    %209 = arith.cmpi eq, %5, %208 : vector<2x8xi32>
    %210 = vector.shape_cast %207 : vector<2x1xf32> to vector<2x1xf32>
    %211 = vector.broadcast %210 : vector<2x1xf32> to vector<2x8xf32>
    %212 = arith.select %209, %211, %184 : vector<2x8xi1>, vector<2x8xf32>
    %c5_89 = arith.constant 5 : index
    %c0_90 = arith.constant 0 : index
    %c0_91 = arith.constant 0 : index
    %213 = vector.load %arg8[%c5_89, %c0_90, %c0_91] : memref<8x2x128xf32, #tpu.memory_space<vmem>>, vector<1x2x128xf32>
    %214 = vector.shape_cast %213 : vector<1x2x128xf32> to vector<2x128xf32>
    %cst_92 = arith.constant dense<0.000000e+00> : vector<2x128xf32>
    %215 = tpu.matmul %203, %1, %cst_92 {dimension_numbers = #tpu.dot_dimension_numbers<[1], [0], [0], [1], [0, 0, 1, 1], [], []>} : vector<2x32xf32>, vector<32x128xf32>, vector<2x128xf32> -> vector<2x128xf32>
    %216 = arith.addf %214, %215 : vector<2x128xf32>
    %217 = arith.negf %216 : vector<2x128xf32>
    %218 = math.exp %217 : vector<2x128xf32>
    %cst_93 = arith.constant 1.000000e+00 : f32
    %219 = vector.broadcast %cst_93 : f32 to vector<2x128xf32>
    %220 = arith.addf %219, %218 : vector<2x128xf32>
    %221 = arith.divf %219, %220 : vector<2x128xf32>
    %222 = math.tanh %216 : vector<2x128xf32>
    %223 = vector.extract_strided_slice %222 {offsets = [0, 96], sizes = [2, 32], strides = [1, 1]} : vector<2x128xf32> to vector<2x32xf32>
    %224 = vector.extract_strided_slice %221 {offsets = [0, 0], sizes = [2, 32], strides = [1, 1]} : vector<2x128xf32> to vector<2x32xf32>
    %225 = vector.extract_strided_slice %221 {offsets = [0, 32], sizes = [2, 32], strides = [1, 1]} : vector<2x128xf32> to vector<2x32xf32>
    %226 = vector.extract_strided_slice %221 {offsets = [0, 64], sizes = [2, 32], strides = [1, 1]} : vector<2x128xf32> to vector<2x32xf32>
    %227 = arith.mulf %224, %201 : vector<2x32xf32>
    %228 = arith.mulf %225, %223 : vector<2x32xf32>
    %229 = arith.addf %227, %228 : vector<2x32xf32>
    %230 = math.tanh %229 : vector<2x32xf32>
    %231 = arith.mulf %226, %230 : vector<2x32xf32>
    %232 = vector.broadcast %3 : vector<1x32xf32> to vector<2x32xf32>
    %233 = arith.mulf %231, %232 : vector<2x32xf32>
    %cst_94 = arith.constant dense<0.000000e+00> : vector<2xf32>
    %234 = vector.multi_reduction <add>, %233, %cst_94 [1] : vector<2x32xf32> to vector<2xf32>
    %235 = vector.shape_cast %234 : vector<2xf32> to vector<2x1xf32>
    %c5_i32 = arith.constant 5 : i32
    %236 = vector.broadcast %c5_i32 : i32 to vector<2x8xi32>
    %237 = arith.cmpi eq, %5, %236 : vector<2x8xi32>
    %238 = vector.shape_cast %235 : vector<2x1xf32> to vector<2x1xf32>
    %239 = vector.broadcast %238 : vector<2x1xf32> to vector<2x8xf32>
    %240 = arith.select %237, %239, %212 : vector<2x8xi1>, vector<2x8xf32>
    %c6_95 = arith.constant 6 : index
    %c0_96 = arith.constant 0 : index
    %c0_97 = arith.constant 0 : index
    %241 = vector.load %arg8[%c6_95, %c0_96, %c0_97] : memref<8x2x128xf32, #tpu.memory_space<vmem>>, vector<1x2x128xf32>
    %242 = vector.shape_cast %241 : vector<1x2x128xf32> to vector<2x128xf32>
    %cst_98 = arith.constant dense<0.000000e+00> : vector<2x128xf32>
    %243 = tpu.matmul %231, %1, %cst_98 {dimension_numbers = #tpu.dot_dimension_numbers<[1], [0], [0], [1], [0, 0, 1, 1], [], []>} : vector<2x32xf32>, vector<32x128xf32>, vector<2x128xf32> -> vector<2x128xf32>
    %244 = arith.addf %242, %243 : vector<2x128xf32>
    %245 = arith.negf %244 : vector<2x128xf32>
    %246 = math.exp %245 : vector<2x128xf32>
    %cst_99 = arith.constant 1.000000e+00 : f32
    %247 = vector.broadcast %cst_99 : f32 to vector<2x128xf32>
    %248 = arith.addf %247, %246 : vector<2x128xf32>
    %249 = arith.divf %247, %248 : vector<2x128xf32>
    %250 = math.tanh %244 : vector<2x128xf32>
    %251 = vector.extract_strided_slice %250 {offsets = [0, 96], sizes = [2, 32], strides = [1, 1]} : vector<2x128xf32> to vector<2x32xf32>
    %252 = vector.extract_strided_slice %249 {offsets = [0, 0], sizes = [2, 32], strides = [1, 1]} : vector<2x128xf32> to vector<2x32xf32>
    %253 = vector.extract_strided_slice %249 {offsets = [0, 32], sizes = [2, 32], strides = [1, 1]} : vector<2x128xf32> to vector<2x32xf32>
    %254 = vector.extract_strided_slice %249 {offsets = [0, 64], sizes = [2, 32], strides = [1, 1]} : vector<2x128xf32> to vector<2x32xf32>
    %255 = arith.mulf %252, %229 : vector<2x32xf32>
    %256 = arith.mulf %253, %251 : vector<2x32xf32>
    %257 = arith.addf %255, %256 : vector<2x32xf32>
    %258 = math.tanh %257 : vector<2x32xf32>
    %259 = arith.mulf %254, %258 : vector<2x32xf32>
    %260 = vector.broadcast %3 : vector<1x32xf32> to vector<2x32xf32>
    %261 = arith.mulf %259, %260 : vector<2x32xf32>
    %cst_100 = arith.constant dense<0.000000e+00> : vector<2xf32>
    %262 = vector.multi_reduction <add>, %261, %cst_100 [1] : vector<2x32xf32> to vector<2xf32>
    %263 = vector.shape_cast %262 : vector<2xf32> to vector<2x1xf32>
    %c6_i32 = arith.constant 6 : i32
    %264 = vector.broadcast %c6_i32 : i32 to vector<2x8xi32>
    %265 = arith.cmpi eq, %5, %264 : vector<2x8xi32>
    %266 = vector.shape_cast %263 : vector<2x1xf32> to vector<2x1xf32>
    %267 = vector.broadcast %266 : vector<2x1xf32> to vector<2x8xf32>
    %268 = arith.select %265, %267, %240 : vector<2x8xi1>, vector<2x8xf32>
    %c7_101 = arith.constant 7 : index
    %c0_102 = arith.constant 0 : index
    %c0_103 = arith.constant 0 : index
    %269 = vector.load %arg8[%c7_101, %c0_102, %c0_103] : memref<8x2x128xf32, #tpu.memory_space<vmem>>, vector<1x2x128xf32>
    %270 = vector.shape_cast %269 : vector<1x2x128xf32> to vector<2x128xf32>
    %cst_104 = arith.constant dense<0.000000e+00> : vector<2x128xf32>
    %271 = tpu.matmul %259, %1, %cst_104 {dimension_numbers = #tpu.dot_dimension_numbers<[1], [0], [0], [1], [0, 0, 1, 1], [], []>} : vector<2x32xf32>, vector<32x128xf32>, vector<2x128xf32> -> vector<2x128xf32>
    %272 = arith.addf %270, %271 : vector<2x128xf32>
    %273 = arith.negf %272 : vector<2x128xf32>
    %274 = math.exp %273 : vector<2x128xf32>
    %cst_105 = arith.constant 1.000000e+00 : f32
    %275 = vector.broadcast %cst_105 : f32 to vector<2x128xf32>
    %276 = arith.addf %275, %274 : vector<2x128xf32>
    %277 = arith.divf %275, %276 : vector<2x128xf32>
    %278 = math.tanh %272 : vector<2x128xf32>
    %279 = vector.extract_strided_slice %278 {offsets = [0, 96], sizes = [2, 32], strides = [1, 1]} : vector<2x128xf32> to vector<2x32xf32>
    %280 = vector.extract_strided_slice %277 {offsets = [0, 0], sizes = [2, 32], strides = [1, 1]} : vector<2x128xf32> to vector<2x32xf32>
    %281 = vector.extract_strided_slice %277 {offsets = [0, 32], sizes = [2, 32], strides = [1, 1]} : vector<2x128xf32> to vector<2x32xf32>
    %282 = vector.extract_strided_slice %277 {offsets = [0, 64], sizes = [2, 32], strides = [1, 1]} : vector<2x128xf32> to vector<2x32xf32>
    %283 = arith.mulf %280, %257 : vector<2x32xf32>
    %284 = arith.mulf %281, %279 : vector<2x32xf32>
    %285 = arith.addf %283, %284 : vector<2x32xf32>
    %286 = math.tanh %285 : vector<2x32xf32>
    %287 = arith.mulf %282, %286 : vector<2x32xf32>
    %288 = vector.broadcast %3 : vector<1x32xf32> to vector<2x32xf32>
    %289 = arith.mulf %287, %288 : vector<2x32xf32>
    %cst_106 = arith.constant dense<0.000000e+00> : vector<2xf32>
    %290 = vector.multi_reduction <add>, %289, %cst_106 [1] : vector<2x32xf32> to vector<2xf32>
    %291 = vector.shape_cast %290 : vector<2xf32> to vector<2x1xf32>
    %c7_i32 = arith.constant 7 : i32
    %292 = vector.broadcast %c7_i32 : i32 to vector<2x8xi32>
    %293 = arith.cmpi eq, %5, %292 : vector<2x8xi32>
    %294 = vector.shape_cast %291 : vector<2x1xf32> to vector<2x1xf32>
    %295 = vector.broadcast %294 : vector<2x1xf32> to vector<2x8xf32>
    %296 = arith.select %293, %295, %268 : vector<2x8xi1>, vector<2x8xf32>
    %297 = vector.broadcast %4 : f32 to vector<2x8xf32>
    %298 = arith.addf %296, %297 : vector<2x8xf32>
    %299 = arith.negf %298 : vector<2x8xf32>
    %300 = math.exp %299 : vector<2x8xf32>
    %cst_107 = arith.constant 1.000000e+00 : f32
    %301 = vector.broadcast %cst_107 : f32 to vector<2x8xf32>
    %302 = arith.addf %301, %300 : vector<2x8xf32>
    %303 = arith.divf %301, %302 : vector<2x8xf32>
    %c0_108 = arith.constant 0 : index
    %c0_109 = arith.constant 0 : index
    %304 = vector.load %arg7[%c0_108, %c0_109] : memref<2x8xf32, #tpu.memory_space<vmem>>, vector<2x8xf32>
    tpu.vector_store %arg7[%c0_108, %c0_109], %303 {strides = array<i32>} : memref<2x8xf32, #tpu.memory_space<vmem>>, vector<2x8xf32>,
    return
  }
  func.func @transform_0(%arg0: i32) -> (i32, i32, i32) {
    %c0_i32 = arith.constant 0 : i32
    %c0_i32_0 = arith.constant 0 : i32
    %c0_i32_1 = arith.constant 0 : i32
    return %c0_i32, %arg0, %c0_i32_0 : i32, i32, i32
  }
  func.func @transform_1(%arg0: i32) -> (i32, i32) {
    %c0_i32 = arith.constant 0 : i32
    %c0_i32_0 = arith.constant 0 : i32
    %c0_i32_1 = arith.constant 0 : i32
    return %c0_i32, %c0_i32_0 : i32, i32
  }
  func.func @transform_2(%arg0: i32) -> (i32, i32) {
    %c0_i32 = arith.constant 0 : i32
    %c0_i32_0 = arith.constant 0 : i32
    %c0_i32_1 = arith.constant 0 : i32
    return %c0_i32, %c0_i32_0 : i32, i32
  }
  func.func @transform_3(%arg0: i32) -> (i32, i32) {
    %c0_i32 = arith.constant 0 : i32
    %c0_i32_0 = arith.constant 0 : i32
    %c0_i32_1 = arith.constant 0 : i32
    return %c0_i32, %c0_i32_0 : i32, i32
  }
  func.func @transform_4(%arg0: i32) -> (i32, i32) {
    %c0_i32 = arith.constant 0 : i32
    %c0_i32_0 = arith.constant 0 : i32
    %c0_i32_1 = arith.constant 0 : i32
    return %c0_i32, %c0_i32_0 : i32, i32
  }
  func.func @transform_5(%arg0: i32) -> i32 {
    %c0_i32 = arith.constant 0 : i32
    %c0_i32_0 = arith.constant 0 : i32
    return %c0_i32 : i32
  }
  func.func @transform_6(%arg0: i32) -> (i32, i32) {
    %c0_i32 = arith.constant 0 : i32
    %c0_i32_0 = arith.constant 0 : i32
    return %arg0, %c0_i32 : i32, i32
  }
}

</mosaic_0001>

<bundles_post_ra>
// kernel: tpu_custom_call.1
= control target key start
LH: loop header
LB: loop body
LE: loop exit
PB: predicated region body
PF: predicated region fallthrough
CT: control target
= control target key end

     0   :  { %12 = vsyncpa [#allocation5], 0  ;;  %s2296_s0 = inlined_call_operand.vmem [shape: f32[8,2,4], index: 0, kind: input, shape index: {}]   ;;  %s2297_s1 = inlined_call_operand.hbm [shape: f32[4,128], index: 1, kind: input, shape index: {}]   ;;  %s2298_s2 = inlined_call_operand.vmem [shape: f32[32,128], index: 2, kind: input, shape index: {}]   ;;  %s2299_s3 = inlined_call_operand.vmem [shape: f32[1,128], index: 3, kind: input, shape index: {}]   ;;  %s2300_s4 = inlined_call_operand.vmem [shape: f32[1,32], index: 4, kind: input, shape index: {}]   ;;  %s2301_s5 = inlined_call_operand.<no memory space> [shape: f32[1], index: 5, kind: input, shape index: {}]   ;;  %s2302_s6 = inlined_call_operand.hbm [shape: f32[2,8], index: 6, kind: output, shape index: {}]  }
   0x1   :  { %13 = vsyncpa [#allocation6], 0  ;;  %s1989_s21 = smov [#allocation4]   ;;  %s1941_s25 = scalar_lea.hbm %s2297_s1, 64 }
   0x2   :  { %s22_s22 = sshll.u32 %s1989_s21, 4  ;;  %p1942_p0 = scmp.ne.s32.totalorder %s2297_s1, %s1941_s25  ;;  %s23_s22 = int_to_ptr.vmem [resolvable:$true] %s22_s22 }
   0x3   :  { %p1945_p1 = scmp.lt.u32.totalorder %s1941_s25, %s2297_s1 }
   0x5   :  { %p1947_p2 = pnand %p1945_p1, %p1942_p0 }
   0x7   :  { %1950 = shalt.err (!%p1947_p2)
}
   0x8   :  { %s1951_s30 = scalar_lea.vmem %s23_s22, 64  ;;  %p1956_p4 = scmp.lt.s32.totalorder %s23_s22, %s23_s22 }
   0x9   :  { %p1952_p3 = scmp.ne.s32.totalorder %s23_s22, %s1951_s30  ;;  %p1957_p5 = scmp.lt.s32.totalorder %s1951_s30, %s1951_s30 }
   0xb   :  { %p1958_p6 = por %p1957_p5, %p1956_p4 }
   0xd   :  { %p1959_p7 = pnand %p1958_p6, %p1952_p3 }
   0xf   :  { %1962 = shalt.err (!%p1959_p7)
}
  0x10   :  { %25 = dma.hbm_to_vmem [thread:$0]  %s2297_s1, 64, %s23_s22, [#allocation5]  }
  0x11   :  { %1985 = dma.done.wait [#allocation5], 64  }
  0x12   :  { %1986 = vsyncadd [#allocation5], 4294967232  ;;  %v1990_v0 = vmov 0.0   ;;  %vm1991_vm0 = vmmov 0   ;;  %vm58_vm1 = vcmask 1043456   ;;  %vm54_vm2 = vcmask 31744  }
  0x13   :  { %1690 = vmatprep.subr.mxu0 %v1990_v0  ;;  %1692 = vmatprep.mubr.msk.f32.mxu0 %vm1991_vm0, %v1990_v0  ;;  %v2049_v1 = vld [vmem:[#allocation4] sm:$0xf]  ;;  %v47_v2 = vld [vmem:[%s2296_s0] sm:$0x3]  ;;  %v1599_v3 = vld [vmem:[%s2296_s0 + $0x4] sm:$0x3] }
  0x14   :  { %1695 = vmatprep.subr.mxu1 %v1990_v0  ;;  %1697 = vmatprep.mubr.msk.f32.mxu1 %vm1991_vm0, %v1990_v0  ;;  %v1605_v4 = vld [vmem:[%s2296_s0 + $0x8] sm:$0x3]  ;;  %v38_v5 = vld [vmem:[%s2298_s2] sm:$0xff]  ;;  %v1611_v7 = vld [vmem:[%s2296_s0 + $0xc] sm:$0x3]  ;;  %v1992_v9 = vmov 0.0|0.0  }
  0x15   :  { %1691 = vmatpush3.msk.msra.mxu0 %vm58_vm1, %v2049_v1  ;;  %1696 = vmatpush3.msk.msra.mxu1 %vm58_vm1, %v2049_v1  ;;  %v39_v6 = vld [vmem:[%s2298_s2 + $0x8] sm:$0xff]  ;;  %v40_v10 = vld [vmem:[%s2298_s2 + $0x10] sm:$0xff]  ;;  %v41_v11 = vld [vmem:[%s2298_s2 + $0x18] sm:$0xff]  ;;  %s1994_s25 = smov 96   ;;  %vm673_vm3 = vcmask 261120   ;;  %vm785_vm4 = vcmask 254976  }
  0x16   :  { %1693 = vmatmul.mubr.msk.f32.vlgmr.msra.gmra.mrb[0].mxu0 %vm54_vm2, %v47_v2  ;;  %1700 = vmatprep.subr.mxu0 %v1990_v0  ;;  %v2092_v8 = vpack.c.bf16 %v39_v6, %v38_v5  ;;  %v2103_v12 = vpack.c.bf16 %v41_v11, %v40_v10  ;;  %v2120_v13 = vld [vmem:[%s2299_s3] ss:$0 sm:$0xff]  ;;  %s1993_s3 = smov 64   ;;  %v1596_v40 = vld [vmem:[%s2296_s0 + $0x2] sm:$0x3]  ;;  %s1995_s11 = smov [#allocation7]  }
  0x17   :  { %1701 = vmatpush3.msk.msra.mxu0 %vm58_vm1, %v2049_v1  ;;  %1702 = vmatprep.mubr.msk.f32.mxu0 %vm1991_vm0, %v1990_v0  ;;  %v1602_v41 = vld [vmem:[%s2296_s0 + $0x6] sm:$0x3]  ;;  %v1608_v42 = vld [vmem:[%s2296_s0 + $0xa] sm:$0x3]  ;;  %v1614_v44 = vld [vmem:[%s2296_s0 + $0xe] sm:$0x3] }
  0x18   :  { %1710 = vmatprep.subr.mxu0 %v1990_v0  ;;  %1705 = vmatprep.subr.mxu1 %v1990_v0  ;;  %s1584_s12 = sshll.u32 %s1995_s11, 4  ;;  %vm1576_vm13 = vcmask 58368   ;;  %s1585_s12 = int_to_ptr.vmem [resolvable:$true] %s1584_s12 }
  0x19   :  { %1698 = vmatmul.mubr.msk.f32.vlgmr.msra.gmra.mrb[0].mxu1 %vm54_vm2, %v1596_v40  ;;  %s1963_s13 = scalar_lea.vmem %s1585_s12, 32  ;;  %p1968_p9 = scmp.lt.s32.totalorder %s1585_s12, %s1585_s12 }
  0x1a   :  { %1703 = vmatmul.mubr.msk.f32.vlgmr.msra.gmra.mrb[2].mxu0 %vm54_vm2, %v1599_v3  ;;  %1706 = vmatpush3.msk.msra.mxu1 %vm58_vm1, %v2049_v1  ;;  %p1964_p8 = scmp.ne.s32.totalorder %s1585_s12, %s1963_s13  ;;  %p1969_p10 = scmp.lt.s32.totalorder %s1963_s13, %s1963_s13 }
  0x1b   :  { %1711 = vmatpush3.msk.msra.mxu0 %vm58_vm1, %v2049_v1  ;;  %1712 = vmatprep.mubr.msk.f32.mxu0 %vm1991_vm0, %v1990_v0 }
  0x1c   :  { %1720 = vmatprep.subr.mxu0 %v1990_v0  ;;  %1707 = vmatprep.mubr.msk.f32.mxu1 %vm1991_vm0, %v1990_v0  ;;  %p1970_p11 = por %p1969_p10, %p1968_p9 }
  0x1d   :  { %1715 = vmatprep.subr.mxu1 %v1990_v0  ;;  %1708 = vmatmul.mubr.msk.f32.vlgmr.msra.gmra.mrb[2].mxu1 %vm54_vm2, %v1602_v41 }
  0x1e   :  { %1713 = vmatmul.mubr.msk.f32.vlgmr.msra.gmra.mrb[4].mxu0 %vm54_vm2, %v1605_v4  ;;  %1716 = vmatpush3.msk.msra.mxu1 %vm58_vm1, %v2049_v1  ;;  %p1971_p12 = pnand %p1970_p11, %p1964_p8 }
  0x1f   :  { %1721 = vmatpush3.msk.msra.mxu0 %vm58_vm1, %v2049_v1  ;;  %1722 = vmatprep.mubr.msk.f32.mxu0 %vm1991_vm0, %v1990_v0 }
  0x20   :  { %1818 = vmatprep.subr.bf16.mxu0 %v1992_v9  ;;  %1717 = vmatprep.mubr.msk.f32.mxu1 %vm1991_vm0, %v1990_v0 }
  0x21   :  { %1725 = vmatprep.subr.mxu1 %v1990_v0  ;;  %1718 = vmatmul.mubr.msk.f32.vlgmr.msra.gmra.mrb[4].mxu1 %vm54_vm2, %v1608_v42 }
  0x22   :  { %1723 = vmatmul.mubr.msk.f32.vlgmr.msra.gmra.mrb[6].mxu0 %vm54_vm2, %v1611_v7  ;;  %1726 = vmatpush3.msk.msra.mxu1 %vm58_vm1, %v2049_v1 }
  0x23   :  { %1820 = vmatpush3.bf16.msra.mxu0 %v2092_v8  ;;  %1738 = vmatprep.mubr.msk.f32.mxu0 %vm1991_vm0, %v1990_v0 }
  0x24   :  { %1821 = vmatprep.subr.bf16.mxu0 %v1992_v9  ;;  %1727 = vmatprep.mubr.msk.f32.mxu1 %vm1991_vm0, %v1990_v0 }
  0x25   :  { %1824 = vmatprep.subr.bf16.mxu1 %v1992_v9  ;;  %1728 = vmatmul.mubr.msk.f32.vlgmr.msra.gmra.mrb[6].mxu1 %vm54_vm2, %v1614_v44 }
  0x26   :  { %1826 = vmatpush3.bf16.msra.mxu1 %v2092_v8  ;;  %1749 = vmatprep.mubr.msk.f32.mxu1 %vm1991_vm0, %v1990_v0 }
  0x27   :  { %1823 = vmatpush3.bf16.msra.mxu0 %v2103_v12  ;;  %1827 = vmatprep.subr.bf16.mxu1 %v1992_v9 }
  0x28   :  { %1830 = vmatprep.subr.bf16.mxu0 %v1992_v9 }
  0x2a   :  { %1739 = vmatmul.mubr.f32.vlgmr.msra.gmra.mrb[8].mxu0 %v1990_v0  ;;  %1829 = vmatpush3.bf16.msra.mxu1 %v2103_v12 }
  0x2b   :  { %1832 = vmatpush3.bf16.msra.mxu0 %v2092_v8  ;;  %1760 = vmatprep.mubr.msk.f32.mxu0 %vm1991_vm0, %v1990_v0 }
  0x2c   :  { %1833 = vmatprep.subr.bf16.mxu0 %v1992_v9  ;;  %1836 = vmatprep.subr.bf16.mxu1 %v1992_v9 }
  0x2f   :  { %1835 = vmatpush3.bf16.msra.mxu0 %v2103_v12 }
  0x30   :  { %1842 = vmatprep.subr.bf16.mxu0 %v1992_v9 }
  0xe9   :  { %v128_v14 = vpop.f32.mrb[0].mxu0 }
  0xea   :  { %v129_v15 = vadd.f32 %v2120_v13, %v128_v14  ;;  %v1694_v16 = vpop.f32.mrb[1].mxu0 }
  0xec   :  { %132 = vst [vmem:[#allocation2] sm:$0x3] %v129_v15  ;;  %v204_v47 = vpop.f32.mrb[0].mxu1 }
  0xed   :  { %v281_v17 = vpop.f32.mrb[2].mxu0  ;;  %v205_v48 = vadd.f32 %v2120_v13, %v204_v47  ;;  %v1699_v49 = vpop.f32.mrb[1].mxu1 }
  0xee   :  { %v282_v18 = vadd.f32 %v2120_v13, %v281_v17  ;;  %v1704_v19 = vpop.f32.mrb[3].mxu0 }
  0xef   :  { %209 = vst [vmem:[#allocation2 + $0x2] sm:$0x3] %v205_v48 }
  0xf0   :  { %286 = vst [vmem:[#allocation2 + $0x4] sm:$0x3] %v282_v18  ;;  %v358_v50 = vpop.f32.mrb[2].mxu1 }
  0xf1   :  { %v435_v20 = vpop.f32.mrb[4].mxu0  ;;  %v359_v51 = vadd.f32 %v2120_v13, %v358_v50  ;;  %v1709_v52 = vpop.f32.mrb[3].mxu1 }
  0xf2   :  { %v436_v21 = vadd.f32 %v2120_v13, %v435_v20  ;;  %v1714_v22 = vpop.f32.mrb[5].mxu0 }
  0xf3   :  { %v672_v26 = vld [vmem:[#allocation2] sm:$0x3]  ;;  %363 = vst [vmem:[#allocation2 + $0x6] sm:$0x3] %v359_v51 }
  0xf4   :  { %440 = vst [vmem:[#allocation2 + $0x8] sm:$0x3] %v436_v21  ;;  %v512_v53 = vpop.f32.mrb[4].mxu1 }
  0xf5   :  { %v589_v23 = vpop.f32.mrb[6].mxu0  ;;  %v513_v54 = vadd.f32 %v2120_v13, %v512_v53  ;;  %v1719_v55 = vpop.f32.mrb[5].mxu1 }
  0xf6   :  { %v590_v24 = vadd.f32 %v2120_v13, %v589_v23  ;;  %v1724_v25 = vpop.f32.mrb[7].mxu0  ;;  %v791_v60 = vld [vmem:[#allocation2 + $0x2] sm:$0x3] }
  0xf7   :  { %517 = vst [vmem:[#allocation2 + $0xa] sm:$0x3] %v513_v54  ;;  %v902_v18 = vld [vmem:[#allocation2 + $0x4] sm:$0x3] }
  0xf8   :  { %594 = vst [vmem:[#allocation2 + $0xc] sm:$0x3] %v590_v24  ;;  %v666_v56 = vpop.f32.mrb[6].mxu1 }
  0xf9   :  { %v667_v57 = vadd.f32 %v2120_v13, %v666_v56  ;;  %v1729_v58 = vpop.f32.mrb[7].mxu1 }
  0xfb   :  { %671 = vst [vmem:[#allocation2 + $0xe] sm:$0x3] %v667_v57  ;;  %v1124_v55 = vld [vmem:[#allocation2 + $0x8] sm:$0x3] }
  0xfd   :  { %v743_v27 = vpop.f32.mrb[8].mxu0 }
  0xfe   :  { %v747_v28 = vadd.f32 %v743_v27, %v672_v26  ;;  %v1740_v29 = vpop.f32.mrb[9].mxu0 }
 0x100   :  { %1873 = vtanh.f32 %v747_v28  ;;  %v1617_v31 = vmul.f32 -1.442695, %v747_v28 }
 0x102   :  { %1875 = vpow2.f32 %v1617_v31 }
 0x10a   :  { %v1874_v30 = vpop.eup %1873 }
 0x10b   :  { %757 = vrot.lane.b32.xlu0 %v1874_v30, %s1993_s3 }
 0x10c   :  { %v1876_v32 = vpop.eup %1875 }
 0x10d   :  { %v751_v33 = vadd.f32 1.0, %v1876_v32 }
 0x10f   :  { %1877 = vrcp.f32 %v751_v33 }
 0x119   :  { %v1878_v34 = vpop.eup %1877 }
 0x11a   :  { %v755_v37 = vmul.f32 0.0, %v1878_v34 }
 0x17d   :  { %v758_v35 = vpop.permute.xlu0 %757 }
 0x17e   :  { %v760_v36 = vmul.f32 %v1878_v34, %v758_v35 }
 0x180   :  { %762 = vrot.lane.b32.xlu0 %v760_v36, %s1994_s25  ;;  %v1013_v36 = vld [vmem:[#allocation2 + $0x6] sm:$0x3] }
 0x1f2   :  { %v763_v38 = vpop.permute.xlu0 %762 }
 0x1f3   :  { %v2128_v39 = vadd.f32 %v763_v38, %v755_v37 }
 0x1f5   :  { %1879 = vtanh.f32 %v2128_v39 }
 0x1ff   :  { %v1880_v43 = vpop.eup %1879 }
 0x200   :  { %768 = vrot.lane.b32.xlu1 %v1880_v43, %s1993_s3 }
 0x272   :  { %v769_v45 = vpop.permute.xlu1 %768 }
 0x273   :  { %v2169_v46 = vmul.f32 %v1878_v34, %v769_v45 }
 0x275   :  { %793 = vrot.lane.b32.xlu1 %v2169_v46, %s1993_s3 }
 0x2e7   :  { %v794_v59 = vpop.permute.xlu1 %793 }
 0x2e8   :  { %1750 = vmatmul.mubr.msk.f32.vlgmr.msra.gmra.mrb[8].mxu1 %vm673_vm3, %v794_v59 }
 0x2e9   :  { %1838 = vmatpush3.bf16.msra.mxu1 %v2092_v8  ;;  %1771 = vmatprep.mubr.msk.f32.mxu1 %vm1991_vm0, %v1990_v0 }
 0x2ea   :  { %1839 = vmatprep.subr.bf16.mxu1 %v1992_v9 }
 0x2ed   :  { %1841 = vmatpush3.bf16.msra.mxu1 %v2103_v12 }
 0x2ee   :  { %1848 = vmatprep.subr.bf16.mxu1 %v1992_v9 }
 0x3bb   :  { %v863_v61 = vpop.f32.mrb[8].mxu1 }
 0x3bc   :  { %v867_v62 = vadd.f32 %v863_v61, %v791_v60  ;;  %v1751_v63 = vpop.f32.mrb[9].mxu1 }
 0x3be   :  { %1881 = vtanh.f32 %v867_v62  ;;  %v1620_v2 = vmul.f32 -1.442695, %v867_v62 }
 0x3c0   :  { %1883 = vpow2.f32 %v1620_v2 }
 0x3c8   :  { %v1882_v1 = vpop.eup %1881 }
 0x3c9   :  { %877 = vrot.lane.b32.xlu0 %v1882_v1, %s1993_s3 }
 0x3ca   :  { %v1884_v3 = vpop.eup %1883 }
 0x3cb   :  { %v871_v4 = vadd.f32 1.0, %v1884_v3 }
 0x3cd   :  { %1885 = vrcp.f32 %v871_v4 }
 0x3d7   :  { %v1886_v5 = vpop.eup %1885 }
 0x3d8   :  { %v875_v10 = vmul.f32 %v1886_v5, %v2128_v39 }
 0x43b   :  { %v878_v6 = vpop.permute.xlu0 %877 }
 0x43c   :  { %v880_v7 = vmul.f32 %v1886_v5, %v878_v6 }
 0x43e   :  { %882 = vrot.lane.b32.xlu1 %v880_v7, %s1994_s25 }
 0x4b0   :  { %v883_v11 = vpop.permute.xlu1 %882 }
 0x4b1   :  { %v885_v13 = vadd.f32 %v883_v11, %v875_v10 }
 0x4b3   :  { %1887 = vtanh.f32 %v885_v13 }
 0x4bd   :  { %v1888_v14 = vpop.eup %1887 }
 0x4be   :  { %888 = vrot.lane.b32.xlu0 %v1888_v14, %s1993_s3 }
 0x530   :  { %v889_v15 = vpop.permute.xlu0 %888 }
 0x531   :  { %v2188_v16 = vmul.f32 %v1886_v5, %v889_v15 }
 0x533   :  { %904 = vrot.lane.b32.xlu1 %v2188_v16, %s1993_s3 }
 0x5a5   :  { %v905_v17 = vpop.permute.xlu1 %904 }
 0x5a6   :  { %1761 = vmatmul.mubr.msk.f32.vlgmr.msra.gmra.mrb[10].mxu0 %vm673_vm3, %v905_v17 }
 0x5a7   :  { %1844 = vmatpush3.bf16.msra.mxu0 %v2092_v8  ;;  %1782 = vmatprep.mubr.msk.f32.mxu0 %vm1991_vm0, %v1990_v0 }
 0x5a8   :  { %1845 = vmatprep.subr.bf16.mxu0 %v1992_v9 }
 0x5ab   :  { %1847 = vmatpush3.bf16.msra.mxu0 %v2103_v12 }
 0x5ac   :  { %1854 = vmatprep.subr.bf16.mxu0 %v1992_v9 }
 0x679   :  { %v974_v19 = vpop.f32.mrb[10].mxu0 }
 0x67a   :  { %v978_v20 = vadd.f32 %v974_v19, %v902_v18  ;;  %v1762_v21 = vpop.f32.mrb[11].mxu0 }
 0x67c   :  { %1889 = vtanh.f32 %v978_v20  ;;  %v1622_v23 = vmul.f32 -1.442695, %v978_v20 }
 0x67e   :  { %1891 = vpow2.f32 %v1622_v23 }
 0x686   :  { %v1890_v22 = vpop.eup %1889 }
 0x687   :  { %988 = vrot.lane.b32.xlu0 %v1890_v22, %s1993_s3 }
 0x688   :  { %v1892_v24 = vpop.eup %1891 }
 0x689   :  { %v982_v25 = vadd.f32 1.0, %v1892_v24 }
 0x68b   :  { %1893 = vrcp.f32 %v982_v25 }
 0x695   :  { %v1894_v26 = vpop.eup %1893 }
 0x696   :  { %v986_v29 = vmul.f32 %v1894_v26, %v885_v13  ;;  %v1235_v13 = vld [vmem:[#allocation2 + $0xa] sm:$0x3] }
 0x6f9   :  { %v989_v27 = vpop.permute.xlu0 %988 }
 0x6fa   :  { %v991_v28 = vmul.f32 %v1894_v26, %v989_v27 }
 0x6fc   :  { %993 = vrot.lane.b32.xlu1 %v991_v28, %s1994_s25  ;;  %v1346_v28 = vld [vmem:[#allocation2 + $0xc] sm:$0x3] }
 0x76e   :  { %v994_v30 = vpop.permute.xlu1 %993 }
 0x76f   :  { %v996_v31 = vadd.f32 %v994_v30, %v986_v29 }
 0x771   :  { %1895 = vtanh.f32 %v996_v31 }
 0x77b   :  { %v1896_v32 = vpop.eup %1895 }
 0x77c   :  { %999 = vrot.lane.b32.xlu0 %v1896_v32, %s1993_s3 }
 0x7ee   :  { %v1000_v33 = vpop.permute.xlu0 %999 }
 0x7ef   :  { %v2202_v34 = vmul.f32 %v1894_v26, %v1000_v33 }
 0x7f1   :  { %1015 = vrot.lane.b32.xlu1 %v2202_v34, %s1993_s3 }
 0x863   :  { %v1016_v35 = vpop.permute.xlu1 %1015 }
 0x864   :  { %1772 = vmatmul.mubr.msk.f32.vlgmr.msra.gmra.mrb[10].mxu1 %vm673_vm3, %v1016_v35 }
 0x865   :  { %1850 = vmatpush3.bf16.msra.mxu1 %v2092_v8  ;;  %1793 = vmatprep.mubr.msk.f32.mxu1 %vm1991_vm0, %v1990_v0 }
 0x866   :  { %1851 = vmatprep.subr.bf16.mxu1 %v1992_v9 }
 0x869   :  { %1853 = vmatpush3.bf16.msra.mxu1 %v2103_v12 }
 0x86a   :  { %1860 = vmatprep.subr.bf16.mxu1 %v1992_v9 }
 0x937   :  { %v1085_v37 = vpop.f32.mrb[10].mxu1 }
 0x938   :  { %v1089_v38 = vadd.f32 %v1085_v37, %v1013_v36  ;;  %v1773_v39 = vpop.f32.mrb[11].mxu1 }
 0x93a   :  { %1897 = vtanh.f32 %v1089_v38  ;;  %v1624_v41 = vmul.f32 -1.442695, %v1089_v38 }
 0x93c   :  { %1899 = vpow2.f32 %v1624_v41 }
 0x944   :  { %v1898_v40 = vpop.eup %1897 }
 0x945   :  { %1099 = vrot.lane.b32.xlu0 %v1898_v40, %s1993_s3 }
 0x946   :  { %v1900_v42 = vpop.eup %1899 }
 0x947   :  { %v1093_v43 = vadd.f32 1.0, %v1900_v42 }
 0x949   :  { %1901 = vrcp.f32 %v1093_v43 }
 0x953   :  { %v1902_v44 = vpop.eup %1901 }
 0x954   :  { %v1097_v48 = vmul.f32 %v1902_v44, %v996_v31 }
 0x9b7   :  { %v1100_v45 = vpop.permute.xlu0 %1099 }
 0x9b8   :  { %v1102_v47 = vmul.f32 %v1902_v44, %v1100_v45 }
 0x9ba   :  { %1104 = vrot.lane.b32.xlu1 %v1102_v47, %s1994_s25 }
 0xa2c   :  { %v1105_v49 = vpop.permute.xlu1 %1104 }
 0xa2d   :  { %v1107_v50 = vadd.f32 %v1105_v49, %v1097_v48  ;;  %v1457_v48 = vld [vmem:[#allocation2 + $0xe] sm:$0x3] }
 0xa2f   :  { %1903 = vtanh.f32 %v1107_v50 }
 0xa39   :  { %v1904_v51 = vpop.eup %1903 }
 0xa3a   :  { %1110 = vrot.lane.b32.xlu0 %v1904_v51, %s1993_s3 }
 0xaac   :  { %v1111_v52 = vpop.permute.xlu0 %1110 }
 0xaad   :  { %v2216_v53 = vmul.f32 %v1902_v44, %v1111_v52 }
 0xaaf   :  { %1126 = vrot.lane.b32.xlu1 %v2216_v53, %s1993_s3 }
 0xb21   :  { %v1127_v54 = vpop.permute.xlu1 %1126 }
 0xb22   :  { %1783 = vmatmul.mubr.msk.f32.vlgmr.msra.gmra.mrb[12].mxu0 %vm673_vm3, %v1127_v54  ;;  %v1618_v54 = vld [vmem:[%s2300_s4] ss:$0 sm:$0xff] }
 0xb23   :  { %1856 = vmatpush3.bf16.msra.mxu0 %v2092_v8  ;;  %1804 = vmatprep.mubr.msk.f32.mxu0 %vm1991_vm0, %v1990_v0 }
 0xb24   :  { %1857 = vmatprep.subr.bf16.mxu0 %v1992_v9 }
 0xb27   :  { %1859 = vmatpush3.bf16.msra.mxu0 %v2103_v12 }
 0xbf5   :  { %v1196_v56 = vpop.f32.mrb[12].mxu0 }
 0xbf6   :  { %v1200_v57 = vadd.f32 %v1196_v56, %v1124_v55  ;;  %v1784_v58 = vpop.f32.mrb[13].mxu0 }
 0xbf8   :  { %1905 = vtanh.f32 %v1200_v57  ;;  %v1626_v60 = vmul.f32 -1.442695, %v1200_v57 }
 0xbfa   :  { %1907 = vpow2.f32 %v1626_v60 }
 0xc02   :  { %v1906_v59 = vpop.eup %1905 }
 0xc03   :  { %1210 = vrot.lane.b32.xlu0 %v1906_v59, %s1993_s3 }
 0xc04   :  { %v1908_v61 = vpop.eup %1907 }
 0xc05   :  { %v1204_v62 = vadd.f32 1.0, %v1908_v61 }
 0xc07   :  { %1909 = vrcp.f32 %v1204_v62 }
 0xc11   :  { %v1910_v63 = vpop.eup %1909 }
 0xc12   :  { %v1208_v3 = vmul.f32 %v1910_v63, %v1107_v50 }
 0xc75   :  { %v1211_v1 = vpop.permute.xlu0 %1210 }
 0xc76   :  { %v1213_v2 = vmul.f32 %v1910_v63, %v1211_v1 }
 0xc78   :  { %1215 = vrot.lane.b32.xlu1 %v1213_v2, %s1994_s25 }
 0xcea   :  { %v1216_v4 = vpop.permute.xlu1 %1215 }
 0xceb   :  { %v1218_v5 = vadd.f32 %v1216_v4, %v1208_v3 }
 0xced   :  { %1911 = vtanh.f32 %v1218_v5 }
 0xcf7   :  { %v1912_v6 = vpop.eup %1911 }
 0xcf8   :  { %1221 = vrot.lane.b32.xlu0 %v1912_v6, %s1993_s3 }
 0xd6a   :  { %v1222_v7 = vpop.permute.xlu0 %1221 }
 0xd6b   :  { %v2229_v10 = vmul.f32 %v1910_v63, %v1222_v7 }
 0xd6d   :  { %1237 = vrot.lane.b32.xlu1 %v2229_v10, %s1993_s3 }
 0xddf   :  { %v1238_v11 = vpop.permute.xlu1 %1237 }
 0xde0   :  { %1794 = vmatmul.mubr.msk.f32.vlgmr.msra.gmra.mrb[12].mxu1 %vm673_vm3, %v1238_v11 }
 0xde1   :  { %1862 = vmatpush3.bf16.msra.mxu1 %v2092_v8  ;;  %1815 = vmatprep.mubr.msk.f32.mxu1 %vm1991_vm0, %v1990_v0 }
 0xde2   :  { %1863 = vmatprep.subr.bf16.mxu1 %v1992_v9 }
 0xde5   :  { %1865 = vmatpush3.bf16.msra.mxu1 %v2103_v12 }
 0xeb3   :  { %v1307_v14 = vpop.f32.mrb[12].mxu1 }
 0xeb4   :  { %v1311_v15 = vadd.f32 %v1307_v14, %v1235_v13  ;;  %v1795_v17 = vpop.f32.mrb[13].mxu1 }
 0xeb6   :  { %1913 = vtanh.f32 %v1311_v15  ;;  %v1628_v19 = vmul.f32 -1.442695, %v1311_v15 }
 0xeb8   :  { %1915 = vpow2.f32 %v1628_v19 }
 0xec0   :  { %v1914_v18 = vpop.eup %1913 }
 0xec1   :  { %1321 = vrot.lane.b32.xlu0 %v1914_v18, %s1993_s3 }
 0xec2   :  { %v1916_v20 = vpop.eup %1915 }
 0xec3   :  { %v1315_v21 = vadd.f32 1.0, %v1916_v20 }
 0xec5   :  { %1917 = vrcp.f32 %v1315_v21 }
 0xecf   :  { %v1918_v8 = vpop.eup %1917 }
 0xed0   :  { %v1319_v9 = vmul.f32 %v1918_v8, %v1218_v5 }
 0xf33   :  { %v1322_v22 = vpop.permute.xlu0 %1321 }
 0xf34   :  { %v1324_v0 = vmul.f32 %v1918_v8, %v1322_v22 }
 0xf36   :  { %1326 = vrot.lane.b32.xlu1 %v1324_v0, %s1994_s25 }
 0xfa8   :  { %v1327_v12 = vpop.permute.xlu1 %1326 }
 0xfa9   :  { %v1329_v23 = vadd.f32 %v1327_v12, %v1319_v9 }
 0xfab   :  { %1919 = vtanh.f32 %v1329_v23 }
 0xfb5   :  { %v1920_v24 = vpop.eup %1919 }
 0xfb6   :  { %1332 = vrot.lane.b32.xlu0 %v1920_v24, %s1993_s3 }
0x1028   :  { %v1333_v25 = vpop.permute.xlu0 %1332 }
0x1029   :  { %v2242_v26 = vmul.f32 %v1918_v8, %v1333_v25 }
0x102b   :  { %1348 = vrot.lane.b32.xlu1 %v2242_v26, %s1993_s3 }
0x109d   :  { %v1349_v27 = vpop.permute.xlu1 %1348 }
0x109e   :  { %1805 = vmatmul.mubr.msk.f32.vlgmr.msra.gmra.mrb[14].mxu0 %vm673_vm3, %v1349_v27 }
0x1171   :  { %v1418_v29 = vpop.f32.mrb[14].mxu0 }
0x1172   :  { %v1422_v30 = vadd.f32 %v1418_v29, %v1346_v28  ;;  %v1806_v31 = vpop.f32.mrb[15].mxu0 }
0x1174   :  { %1921 = vtanh.f32 %v1422_v30  ;;  %v1630_v33 = vmul.f32 -1.442695, %v1422_v30 }
0x1176   :  { %1923 = vpow2.f32 %v1630_v33 }
0x117e   :  { %v1922_v32 = vpop.eup %1921 }
0x117f   :  { %1432 = vrot.lane.b32.xlu0 %v1922_v32, %s1993_s3 }
0x1180   :  { %v1924_v35 = vpop.eup %1923 }
0x1181   :  { %v1426_v36 = vadd.f32 1.0, %v1924_v35 }
0x1183   :  { %1925 = vrcp.f32 %v1426_v36 }
0x118d   :  { %v1926_v37 = vpop.eup %1925 }
0x118e   :  { %v1430_v40 = vmul.f32 %v1926_v37, %v1329_v23 }
0x11f1   :  { %v1433_v38 = vpop.permute.xlu0 %1432 }
0x11f2   :  { %v1435_v39 = vmul.f32 %v1926_v37, %v1433_v38 }
0x11f4   :  { %1437 = vrot.lane.b32.xlu1 %v1435_v39, %s1994_s25 }
0x1266   :  { %v1438_v41 = vpop.permute.xlu1 %1437 }
0x1267   :  { %v1440_v42 = vadd.f32 %v1438_v41, %v1430_v40  ;;  %v1568_v41 = vstv %s2301_s5 }
0x1269   :  { %1927 = vtanh.f32 %v1440_v42 }
0x1273   :  { %v1928_v43 = vpop.eup %1927 }
0x1274   :  { %1443 = vrot.lane.b32.xlu0 %v1928_v43, %s1993_s3 }
0x12e6   :  { %v1444_v44 = vpop.permute.xlu0 %1443 }
0x12e7   :  { %v1446_v45 = vmul.f32 %v1926_v37, %v1444_v44 }
0x12e9   :  { %1459 = vrot.lane.b32.xlu1 %v1446_v45, %s1993_s3 }
0x135b   :  { %v1460_v47 = vpop.permute.xlu1 %1459 }
0x135c   :  { %1816 = vmatmul.mubr.msk.f32.vlgmr.msra.gmra.mrb[14].mxu1 %vm673_vm3, %v1460_v47 }
0x142f   :  { %v1529_v49 = vpop.f32.mrb[14].mxu1 }
0x1430   :  { %v1533_v50 = vadd.f32 %v1529_v49, %v1457_v48  ;;  %v1817_v51 = vpop.f32.mrb[15].mxu1 }
0x1432   :  { %1929 = vtanh.f32 %v1533_v50  ;;  %v1632_v55 = vmul.f32 -1.442695, %v1533_v50 }
0x1434   :  { %1931 = vpow2.f32 %v1632_v55 }
0x143c   :  { %v1930_v52 = vpop.eup %1929 }
0x143d   :  { %1543 = vrot.lane.b32.xlu0 %v1930_v52, %s1993_s3 }
0x143e   :  { %v1932_v56 = vpop.eup %1931 }
0x143f   :  { %v1537_v57 = vadd.f32 1.0, %v1932_v56 }
0x1441   :  { %777 = vrot.lane.b32.xlu0 %v1618_v54, %s1993_s3  ;;  %1933 = vrcp.f32 %v1537_v57 }
0x144b   :  { %v1934_v58 = vpop.eup %1933 }
0x144c   :  { %v1541_v1 = vmul.f32 %v1934_v58, %v1440_v42 }
0x14af   :  { %v1544_v59 = vpop.permute.xlu0 %1543 }
0x14b0   :  { %v1546_v60 = vmul.f32 %v1934_v58, %v1544_v59 }
0x14b2   :  { %1548 = vrot.lane.b32.xlu1 %v1546_v60, %s1994_s25 }
0x14b3   :  { %v778_v61 = vpop.permute.xlu0 %777 }
0x14b4   :  { %v780_v62 = vmul.f32 %v778_v61, %v2169_v46  ;;  %v892_v63 = vmul.f32 %v2188_v16, %v778_v61  ;;  %v1114_v46 = vmul.f32 %v2216_v53, %v778_v61  ;;  %v1447_v16 = vmul.f32 %v1446_v45, %v778_v61 }
0x14b5   :  { %v1003_v13 = vmul.f32 %v2202_v34, %v778_v61  ;;  %v1225_v14 = vmul.f32 %v2229_v10, %v778_v61  ;;  %v1336_v15 = vmul.f32 %v2242_v26, %v778_v61  ;;  %v45_v10 = vlaneseq }
0x14b6   :  { %782 = vrot.lane.b32.xlu0 %v780_v62, %s1993_s3 }
0x14b7   :  { %v46_v22 = vand.u32 127, %v45_v10 }
0x14b9   :  { %vm789_vm5 = vcmp.eq.s32.totalorder %v46_v22, 0  ;;  %vm900_vm6 = vcmp.eq.s32.totalorder %v46_v22, 1  ;;  %vm1011_vm7 = vcmp.eq.s32.totalorder %v46_v22, 2  ;;  %vm1122_vm8 = vcmp.eq.s32.totalorder %v46_v22, 3 }
0x14ba   :  { %894 = vrot.lane.b32.xlu0 %v892_v63, %s1993_s3  ;;  %vm1233_vm9 = vcmp.eq.s32.totalorder %v46_v22, 4  ;;  %vm1344_vm10 = vcmp.eq.s32.totalorder %v46_v22, 5  ;;  %vm1455_vm11 = vcmp.eq.s32.totalorder %v46_v22, 6  ;;  %vm1566_vm12 = vcmp.eq.s32.totalorder %v46_v22, 7 }
0x1524   :  { %v1549_v2 = vpop.permute.xlu1 %1548 }
0x1525   :  { %v1551_v3 = vadd.f32 %v1549_v2, %v1541_v1 }
0x1527   :  { %1935 = vtanh.f32 %v1551_v3 }
0x1528   :  { %v783_v4 = vpop.permute.xlu0 %782 }
0x1529   :  { %v786_v11 = vsel %vm785_vm4, %v783_v4, 0.0 }
0x152c   :  { %v895_v5 = vpop.permute.xlu0 %894 }
0x152d   :  { %v897_v6 = vsel %vm785_vm4, %v895_v5, 0.0 }
0x152e   :  { %898 = vadd.xlane.f32.xlu0 %v897_v6 }
0x1531   :  { %v1936_v7 = vpop.eup %1935 }
0x1532   :  { %1554 = vrot.lane.b32.xlu1 %v1936_v7, %s1993_s3 }
0x1544   :  { %1116 = vrot.lane.b32.xlu0 %v1114_v46, %s1993_s3 }
0x1548   :  { %1449 = vrot.lane.b32.xlu0 %v1447_v16, %s1993_s3 }
0x1556   :  { %787 = vadd.xlane.f32.xlu1 %v786_v11 }
0x1567   :  { %1005 = vrot.lane.b32.xlu1 %v1003_v13, %s1993_s3 }
0x156b   :  { %1227 = vrot.lane.b32.xlu1 %v1225_v14, %s1993_s3 }
0x156f   :  { %1338 = vrot.lane.b32.xlu1 %v1336_v15, %s1993_s3 }
0x15a4   :  { %v1555_v53 = vpop.permute.xlu1 %1554 }
0x15a5   :  { %v1557_v17 = vmul.f32 %v1934_v58, %v1555_v53 }
0x15a7   :  { %v1558_v18 = vmul.f32 %v1557_v17, %v778_v61 }
0x15a9   :  { %1560 = vrot.lane.b32.xlu1 %v1558_v18, %s1993_s3 }
0x15bb   :  { %v899_v19 = vpop.xlane.xlu0 %898 }
0x15bf   :  { %v1117_v20 = vpop.permute.xlu0 %1116 }
0x15c0   :  { %v1119_v21 = vsel %vm785_vm4, %v1117_v20, 0.0 }
0x15c3   :  { %v1450_v34 = vpop.permute.xlu0 %1449 }
0x15c4   :  { %v1452_v8 = vsel %vm785_vm4, %v1450_v34, 0.0 }
0x15cd   :  { %1120 = vadd.xlane.f32.xlu1 %v1119_v21 }
0x15d1   :  { %1453 = vadd.xlane.f32.xlu1 %v1452_v8 }
0x15e3   :  { %v788_v0 = vpop.xlane.xlu1 %787 }
0x15e4   :  { %v790_v9 = vsel %vm789_vm5, %v788_v0, 0.0 }
0x15e5   :  { %v901_v12 = vsel %vm900_vm6, %v899_v19, %v790_v9 }
0x15e7   :  { %v1006_v23 = vpop.permute.xlu1 %1005 }
0x15e8   :  { %v1008_v24 = vsel %vm785_vm4, %v1006_v23, 0.0 }
0x15e9   :  { %1009 = vadd.xlane.f32.xlu0 %v1008_v24 }
0x15eb   :  { %v1228_v25 = vpop.permute.xlu1 %1227 }
0x15ec   :  { %v1230_v26 = vsel %vm785_vm4, %v1228_v25, 0.0 }
0x15ed   :  { %1231 = vadd.xlane.f32.xlu0 %v1230_v26 }
0x15ef   :  { %v1339_v27 = vpop.permute.xlu1 %1338 }
0x15f0   :  { %v1341_v28 = vsel %vm785_vm4, %v1339_v27, 0.0 }
0x15f1   :  { %1342 = vadd.xlane.f32.xlu0 %v1341_v28 }
0x161b   :  { %v1561_v29 = vpop.permute.xlu1 %1560 }
0x161c   :  { %v1563_v30 = vsel %vm785_vm4, %v1561_v29, 0.0 }
0x161d   :  { %1564 = vadd.xlane.f32.xlu0 %v1563_v30 }
0x165a   :  { %v1121_v35 = vpop.xlane.xlu1 %1120 }
0x165e   :  { %v1454_v40 = vpop.xlane.xlu1 %1453 }
0x1676   :  { %v1010_v31 = vpop.xlane.xlu0 %1009 }
0x1677   :  { %v1012_v33 = vsel %vm1011_vm7, %v1010_v31, %v901_v12 }
0x1678   :  { %v1123_v37 = vsel %vm1122_vm8, %v1121_v35, %v1012_v33 }
0x167a   :  { %v1232_v32 = vpop.xlane.xlu0 %1231 }
0x167b   :  { %v1234_v38 = vsel %vm1233_vm9, %v1232_v32, %v1123_v37 }
0x167e   :  { %v1343_v36 = vpop.xlane.xlu0 %1342 }
0x167f   :  { %v1345_v39 = vsel %vm1344_vm10, %v1343_v36, %v1234_v38 }
0x1680   :  { %v1456_v43 = vsel %vm1455_vm11, %v1454_v40, %v1345_v39 }
0x16aa   :  { %v1565_v42 = vpop.xlane.xlu0 %1564 }
0x16ab   :  { %v1567_v44 = vsel %vm1566_vm12, %v1565_v42, %v1456_v43 }
0x16ac   :  { %v1569_v45 = vadd.f32 %v1568_v41, %v1567_v44 }
0x16ae   :  { %v1633_v47 = vmul.f32 -1.442695, %v1569_v45 }
0x16b0   :  { %1937 = vpow2.f32 %v1633_v47 }
0x16ba   :  { %v1938_v48 = vpop.eup %1937 }
0x16bb   :  { %v1573_v49 = vadd.f32 1.0, %v1938_v48 }
0x16bd   :  { %1939 = vrcp.f32 %v1573_v49 }
0x16c7   :  { %v1940_v50 = vpop.eup %1939 }
0x16c8   :  { %1577 = vst.msk [vmem:[#allocation7] sm:$0x3] %vm1576_vm13, %v1940_v50 }
0x16c9   :  { %1974 = shalt.err (!%p1971_p12)
}
0x16ca   :  { %s1975_s15 = scalar_lea.hbm %s2302_s6, 32 }
0x16cb   :  { %p1976_p13 = scmp.ne.s32.totalorder %s2302_s6, %s1975_s15  ;;  %p1979_p0 = scmp.lt.u32.totalorder %s1975_s15, %s2302_s6 }
0x16cd   :  { %p1981_p1 = pnand %p1979_p0, %p1976_p13 }
0x16cf   :  { %1984 = shalt.err (!%p1981_p1)
}
0x16d0   :  { %1587 = dma.vmem_to_hbm [thread:$0]  %s1585_s12, 32, %s2302_s6, [#allocation6]  }
0x16d1   :  { %1987 = dma.done.wait [#allocation6], 32  }
0x16d2   :  { %1988 = vsyncadd [#allocation6], 4294967264 }
0x16d3   :  { %1591 = vsyncpa [#allocation5], 1 }
0x16d4   :  { %1592 = vsyncpa [#allocation6], 1 }

</bundles_post_ra>
